<compile_context>
chip_gen: v7x
topology: tpu7x:2x2x1
jax: 0.10.0
libtpu: 0.0.40
codegen_flags: <defaults>
</compile_context>

<pallas_src>
import math

import jax
import jax.numpy as jnp
from jax import lax
from jax.experimental import pallas as pl
from jax.experimental.pallas import tpu as pltpu


# ------------------------------ kernel ------------------------------

def _biasfree_ln_kernel(x_ref, w_ref, o_ref):
    x = x_ref[...].astype(jnp.float32)                     # (TR, C)
    inv_c = jnp.float32(1.0 / x.shape[-1])
    s1 = jnp.sum(x, axis=-1, keepdims=True)                # XLU reduce
    s2 = jnp.sum(x * x, axis=-1, keepdims=True)            # XLU reduce (indep.)
    mu = s1 * inv_c
    var = jnp.maximum(s2 * inv_c - mu * mu, 0.0)           # unbiased=False
    inv = lax.rsqrt(var + 1e-5)                            # EUP rsqrt
    w = w_ref[...].astype(jnp.float32)                     # (1, C) broadcast
    # BiasFree: scale x itself (no mean subtraction, no beta).
    o_ref[...] = (x * inv * w).astype(o_ref.dtype)


# ------------------------------ wrapper ------------------------------

def _choose_block_rows(R, C, itemsize, target_bytes=2 << 20):
    """Largest sublane-aligned row tile with ~target_bytes per buffer."""
    tr = target_bytes // max(1, C * itemsize)
    tr = min(tr, R, 4096)
    if tr >= R:
        return R                      # whole array in one tile (full-dim block)
    tr = max(8, (tr // 8) * 8)        # keep the (8, 128) sublane alignment
    return tr


def biasfree_layernorm(x, weight, *, block_rows=None):
    """BiasFree LayerNorm over the last dim of `x` with per-channel `weight`."""
    orig_shape = x.shape
    C = orig_shape[-1]
    R = math.prod(orig_shape[:-1])

    x2 = x.reshape(R, C)
    w2 = weight.reshape(1, C).astype(x.dtype)

    if block_rows is None:
        TR = _choose_block_rows(R, C, x2.dtype.itemsize)
    else:
        TR = min(block_rows, R)
    grid = (pl.cdiv(R, TR),)

    out = pl.pallas_call(
        _biasfree_ln_kernel,
        out_shape=jax.ShapeDtypeStruct((R, C), x.dtype),
        grid=grid,
        in_specs=[
            pl.BlockSpec((TR, C), lambda i: (i, 0)),        # activation tile
            pl.BlockSpec((1, C), lambda i: (0, 0)),         # weight (resident)
        ],
        out_specs=pl.BlockSpec((TR, C), lambda i: (i, 0)),
        compiler_params=pltpu.CompilerParams(
            dimension_semantics=("parallel",)),             # megacore on v7x
    )(x2, w2)

    return out.reshape(orig_shape)


# --------------------- pure-JAX reference (checking) ---------------------

def reference_biasfree_ln(x, weight):
    var = jnp.var(x, axis=-1, keepdims=True)                # ddof=0
    return x / jnp.sqrt(var + 1e-5) * weight


# ------------------------------- main -------------------------------

if __name__ == "__main__":
    # Small shapes consistent with the module: tokens = 2 x 256, channels = 128
    # (channel count a multiple of 128 so every store is a lane-dense vst).
    b, tokens, c = 2, 256, 128

    key = jax.random.PRNGKey(0)
    kx, kw = jax.random.split(key)
    x = jax.random.normal(kx, (b, tokens, c), jnp.float32)
    weight = 1.0 + 0.1 * jax.random.normal(kw, (c,), jnp.float32)

    out = jax.block_until_ready(biasfree_layernorm(x, weight))
    ref = reference_biasfree_ln(x, weight)

    assert out.shape == ref.shape == (b, tokens, c)
    assert bool(jnp.all(jnp.isfinite(out)))
    assert bool(jnp.allclose(out, ref, atol=1e-5, rtol=1e-5)), \
        float(jnp.max(jnp.abs(out - ref)))
    print("KERNEL_OK")
</pallas_src>

<mosaic_0001>
module attributes {stable_mosaic.version = 11 : i64} {
  func.func @_biasfree_ln_kernel(%arg0: i32, %arg1: memref<512x128xf32, #tpu.memory_space<vmem>>, %arg2: memref<1x128xf32, #tpu.memory_space<vmem>>, %arg3: memref<512x128xf32, #tpu.memory_space<vmem>>) attributes {dimension_semantics = [#tpu.dimension_semantics<parallel>], iteration_bounds = array<i64: 1>, scalar_prefetch = 0 : i64, scratch_operands = 0 : i64, tpu.core_type = #tpu.core_type<tc>, window_params = [{transform_indices = @transform_0, window_bounds = array<i64: 512, 128>}, {pipeline_mode = #tpu.pipeline_mode<synchronous>, transform_indices = @transform_1, window_bounds = array<i64: 1, 128>}, {transform_indices = @transform_2, window_bounds = array<i64: 512, 128>}]} {
    %c0 = arith.constant 0 : index
    %c0_0 = arith.constant 0 : index
    %0 = vector.load %arg1[%c0, %c0_0] : memref<512x128xf32, #tpu.memory_space<vmem>>, vector<512x128xf32>
    %cst = arith.constant dense<0.000000e+00> : vector<512xf32>
    %1 = vector.multi_reduction <add>, %0, %cst [1] : vector<512x128xf32> to vector<512xf32>
    %2 = vector.shape_cast %1 : vector<512xf32> to vector<512x1xf32>
    %3 = arith.mulf %0, %0 : vector<512x128xf32>
    %cst_1 = arith.constant dense<0.000000e+00> : vector<512xf32>
    %4 = vector.multi_reduction <add>, %3, %cst_1 [1] : vector<512x128xf32> to vector<512xf32>
    %5 = vector.shape_cast %4 : vector<512xf32> to vector<512x1xf32>
    %cst_2 = arith.constant 7.812500e-03 : f32
    %6 = vector.broadcast %cst_2 : f32 to vector<512x1xf32>
    %7 = arith.mulf %2, %6 : vector<512x1xf32>
    %cst_3 = arith.constant 7.812500e-03 : f32
    %8 = vector.broadcast %cst_3 : f32 to vector<512x1xf32>
    %9 = arith.mulf %5, %8 : vector<512x1xf32>
    %10 = arith.mulf %7, %7 : vector<512x1xf32>
    %11 = arith.subf %9, %10 : vector<512x1xf32>
    %cst_4 = arith.constant 0.000000e+00 : f32
    %12 = vector.broadcast %cst_4 : f32 to vector<512x1xf32>
    %13 = arith.maximumf %11, %12 : vector<512x1xf32>
    %cst_5 = arith.constant 9.99999974E-6 : f32
    %14 = vector.broadcast %cst_5 : f32 to vector<512x1xf32>
    %15 = arith.addf %13, %14 : vector<512x1xf32>
    %16 = math.rsqrt %15 : vector<512x1xf32>
    %c0_6 = arith.constant 0 : index
    %c0_7 = arith.constant 0 : index
    %17 = vector.load %arg2[%c0_6, %c0_7] : memref<1x128xf32, #tpu.memory_space<vmem>>, vector<1x128xf32>
    %18 = vector.broadcast %16 : vector<512x1xf32> to vector<512x128xf32>
    %19 = arith.mulf %0, %18 : vector<512x128xf32>
    %20 = vector.broadcast %17 : vector<1x128xf32> to vector<512x128xf32>
    %21 = arith.mulf %19, %20 : vector<512x128xf32>
    %c0_8 = arith.constant 0 : index
    %c0_9 = arith.constant 0 : index
    %22 = vector.load %arg3[%c0_8, %c0_9] : memref<512x128xf32, #tpu.memory_space<vmem>>, vector<512x128xf32>
    tpu.vector_store %arg3[%c0_8, %c0_9], %21 {strides = array<i32>} : memref<512x128xf32, #tpu.memory_space<vmem>>, vector<512x128xf32>,
    return
  }
  func.func @transform_0(%arg0: i32) -> (i32, i32) {
    %c0_i32 = arith.constant 0 : i32
    %c0_i32_0 = arith.constant 0 : i32
    return %arg0, %c0_i32 : i32, i32
  }
  func.func @transform_1(%arg0: i32) -> (i32, i32) {
    %c0_i32 = arith.constant 0 : i32
    %c0_i32_0 = arith.constant 0 : i32
    %c0_i32_1 = arith.constant 0 : i32
    return %c0_i32, %c0_i32_0 : i32, i32
  }
  func.func @transform_2(%arg0: i32) -> (i32, i32) {
    %c0_i32 = arith.constant 0 : i32
    %c0_i32_0 = arith.constant 0 : i32
    return %arg0, %c0_i32 : i32, i32
  }
}

</mosaic_0001>

<bundles_post_ra>
// kernel: tpu_custom_call.1
= control target key start
LH: loop header
LB: loop body
LE: loop exit
PB: predicated region body
PF: predicated region fallthrough
CT: control target
= control target key end

     0   :  { %7 = vsyncpa [#allocation3], 0  ;;  %s2135_s0 = inlined_call_operand.hbm [shape: f32[512,128], index: 0, kind: input, shape index: {}]   ;;  %s2136_s1 = inlined_call_operand.vmem [shape: f32[1,128], index: 1, kind: input, shape index: {}]   ;;  %s2137_s2 = inlined_call_operand.hbm [shape: f32[512,128], index: 2, kind: output, shape index: {}]  }
   0x1   :  { %8 = vsyncpa [#allocation4], 0  ;;  %s1312_s9 = smov [#allocation2]   ;;  %s1264_s13 = scalar_lea.hbm %s2135_s0, 8192 }
   0x2   :  { %s14_s10 = sshll.u32 %s1312_s9, 4  ;;  %p1265_p0 = scmp.ne.s32.totalorder %s2135_s0, %s1264_s13  ;;  %s15_s10 = int_to_ptr.vmem [resolvable:$true] %s14_s10 }
   0x3   :  { %p1268_p1 = scmp.lt.u32.totalorder %s1264_s13, %s2135_s0 }
   0x5   :  { %p1270_p2 = pnand %p1268_p1, %p1265_p0 }
   0x7   :  { %1273 = shalt.err (!%p1270_p2)
}
   0x8   :  { %s1274_s18 = scalar_lea.vmem %s15_s10, 8192  ;;  %p1279_p4 = scmp.lt.s32.totalorder %s15_s10, %s15_s10 }
   0x9   :  { %p1275_p3 = scmp.ne.s32.totalorder %s15_s10, %s1274_s18  ;;  %p1280_p5 = scmp.lt.s32.totalorder %s1274_s18, %s1274_s18 }
   0xb   :  { %p1281_p6 = por %p1280_p5, %p1279_p4 }
   0xd   :  { %p1282_p7 = pnand %p1281_p6, %p1275_p3 }
   0xf   :  { %1285 = shalt.err (!%p1282_p7)
}
  0x10   :  { %s1313_s19 = smov 128   ;;  %s1314_s20 = smov 8  }
  0x11   :  { %20 = dma.hbm_to_vmem [thread:$0]  %s2135_s0, 8192, %s15_s10, [#allocation3], %s1313_s19, %s1313_s19, %s1314_s20  }
  0x12   :  { %1308 = dma.done.wait [#allocation3], 8192  }
  0x13   :  { %1309 = vsyncadd [#allocation3], 4294959104  ;;  %v1346_v0 = vld [vmem:[#allocation2 + $0x10] sm:$0xff]  ;;  %v1348_v1 = vld [vmem:[#allocation2] sm:$0xff] }
  0x14   :  { %2146 = vst [vmem:[#allocation8_spill] sm:$0xff] %v1346_v0  ;;  %94 = vadd.xlane.f32.xlu1 %v1346_v0  ;;  %90 = vadd.xlane.f32.xlu0 %v1348_v1  ;;  %v1352_v2 = vld [vmem:[#allocation2 + $0x18] sm:$0xff]  ;;  %v1354_v3 = vld [vmem:[#allocation2 + $0x8] sm:$0xff]  ;;  %v1360_v5 = vld [vmem:[#allocation2 + $0x20] sm:$0xff] }
  0x15   :  { %v1358_v4 = vld [vmem:[#allocation2 + $0x28] sm:$0xff]  ;;  %v1364_v6 = vld [vmem:[#allocation2 + $0x38] sm:$0xff]  ;;  %v1366_v7 = vld [vmem:[#allocation2 + $0x30] sm:$0xff] }
  0x16   :  { %2147 = vst [vmem:[#allocation9_spill] sm:$0xff] %v1358_v4  ;;  %v1370_v8 = vld [vmem:[#allocation2 + $0x48] sm:$0xff]  ;;  %v1372_v9 = vld [vmem:[#allocation2 + $0x40] sm:$0xff]  ;;  %v1376_v10 = vld [vmem:[#allocation2 + $0x58] sm:$0xff] }
  0x17   :  { %v1378_v11 = vld [vmem:[#allocation2 + $0x50] sm:$0xff]  ;;  %v1382_v12 = vld [vmem:[#allocation2 + $0x68] sm:$0xff]  ;;  %v1384_v13 = vld [vmem:[#allocation2 + $0x60] sm:$0xff] }
  0x18   :  { %96 = vadd.xlane.f32.xlu1 %v1352_v2  ;;  %92 = vadd.xlane.f32.xlu0 %v1354_v3  ;;  %v1388_v14 = vld [vmem:[#allocation2 + $0x78] sm:$0xff]  ;;  %v1390_v15 = vld [vmem:[#allocation2 + $0x70] sm:$0xff]  ;;  %v1394_v16 = vld [vmem:[#allocation2 + $0x88] sm:$0xff] }
  0x19   :  { %v1396_v17 = vld [vmem:[#allocation2 + $0x80] sm:$0xff]  ;;  %v1400_v18 = vld [vmem:[#allocation2 + $0x98] sm:$0xff]  ;;  %v1402_v19 = vld [vmem:[#allocation2 + $0x90] sm:$0xff] }
  0x1a   :  { %v1406_v20 = vld [vmem:[#allocation2 + $0xa8] sm:$0xff]  ;;  %v1408_v21 = vld [vmem:[#allocation2 + $0xa0] sm:$0xff]  ;;  %v1412_v22 = vld [vmem:[#allocation2 + $0xb8] sm:$0xff] }
  0x1b   :  { %v1414_v23 = vld [vmem:[#allocation2 + $0xb0] sm:$0xff]  ;;  %v1418_v24 = vld [vmem:[#allocation2 + $0xc8] sm:$0xff]  ;;  %v1420_v25 = vld [vmem:[#allocation2 + $0xc0] sm:$0xff] }
  0x1c   :  { %100 = vadd.xlane.f32.xlu1 %v1358_v4  ;;  %98 = vadd.xlane.f32.xlu0 %v1360_v5  ;;  %v1424_v26 = vld [vmem:[#allocation2 + $0xd8] sm:$0xff]  ;;  %v1426_v27 = vld [vmem:[#allocation2 + $0xd0] sm:$0xff]  ;;  %v1430_v28 = vld [vmem:[#allocation2 + $0xe8] sm:$0xff] }
  0x1d   :  { %v1432_v29 = vld [vmem:[#allocation2 + $0xe0] sm:$0xff]  ;;  %v1436_v30 = vld [vmem:[#allocation2 + $0xf8] sm:$0xff]  ;;  %v1438_v31 = vld [vmem:[#allocation2 + $0xf0] sm:$0xff] }
  0x1e   :  { %v1442_v32 = vld [vmem:[#allocation2 + $0x108] sm:$0xff]  ;;  %v1444_v33 = vld [vmem:[#allocation2 + $0x100] sm:$0xff]  ;;  %v1448_v34 = vld [vmem:[#allocation2 + $0x118] sm:$0xff] }
  0x1f   :  { %v1450_v35 = vld [vmem:[#allocation2 + $0x110] sm:$0xff]  ;;  %v1454_v36 = vld [vmem:[#allocation2 + $0x128] sm:$0xff]  ;;  %v1456_v37 = vld [vmem:[#allocation2 + $0x120] sm:$0xff] }
  0x20   :  { %104 = vadd.xlane.f32.xlu1 %v1364_v6  ;;  %102 = vadd.xlane.f32.xlu0 %v1366_v7  ;;  %v1460_v38 = vld [vmem:[#allocation2 + $0x138] sm:$0xff]  ;;  %v1462_v39 = vld [vmem:[#allocation2 + $0x130] sm:$0xff]  ;;  %v1466_v40 = vld [vmem:[#allocation2 + $0x148] sm:$0xff] }
  0x21   :  { %v1468_v41 = vld [vmem:[#allocation2 + $0x140] sm:$0xff]  ;;  %v1472_v42 = vld [vmem:[#allocation2 + $0x158] sm:$0xff]  ;;  %v1474_v43 = vld [vmem:[#allocation2 + $0x150] sm:$0xff] }
  0x22   :  { %v1478_v44 = vld [vmem:[#allocation2 + $0x168] sm:$0xff]  ;;  %v1480_v45 = vld [vmem:[#allocation2 + $0x160] sm:$0xff]  ;;  %v1484_v46 = vld [vmem:[#allocation2 + $0x178] sm:$0xff] }
  0x23   :  { %v1486_v47 = vld [vmem:[#allocation2 + $0x170] sm:$0xff]  ;;  %v1490_v48 = vld [vmem:[#allocation2 + $0x188] sm:$0xff]  ;;  %v1492_v49 = vld [vmem:[#allocation2 + $0x180] sm:$0xff] }
  0x24   :  { %108 = vadd.xlane.f32.xlu1 %v1370_v8  ;;  %106 = vadd.xlane.f32.xlu0 %v1372_v9  ;;  %v1496_v50 = vld [vmem:[#allocation2 + $0x198] sm:$0xff]  ;;  %v1498_v51 = vld [vmem:[#allocation2 + $0x190] sm:$0xff]  ;;  %v1502_v52 = vld [vmem:[#allocation2 + $0x1a8] sm:$0xff] }
  0x25   :  { %v1504_v53 = vld [vmem:[#allocation2 + $0x1a0] sm:$0xff]  ;;  %v1508_v54 = vld [vmem:[#allocation2 + $0x1b8] sm:$0xff]  ;;  %v1510_v55 = vld [vmem:[#allocation2 + $0x1b0] sm:$0xff] }
  0x26   :  { %v1514_v56 = vld [vmem:[#allocation2 + $0x1c8] sm:$0xff]  ;;  %v1516_v57 = vld [vmem:[#allocation2 + $0x1c0] sm:$0xff]  ;;  %v1520_v58 = vld [vmem:[#allocation2 + $0x1d8] sm:$0xff] }
  0x27   :  { %2148 = vst [vmem:[#allocation10_spill] sm:$0xff] %v1520_v58  ;;  %v1522_v59 = vld [vmem:[#allocation2 + $0x1d0] sm:$0xff]  ;;  %v1526_v60 = vld [vmem:[#allocation2 + $0x1e8] sm:$0xff]  ;;  %v1528_v61 = vld [vmem:[#allocation2 + $0x1e0] sm:$0xff] }
  0x28   :  { %112 = vadd.xlane.f32.xlu1 %v1376_v10  ;;  %110 = vadd.xlane.f32.xlu0 %v1378_v11  ;;  %2149 = vst [vmem:[#allocation11_spill] sm:$0xff] %v1522_v59  ;;  %2150 = vst [vmem:[#allocation12_spill] sm:$0xff] %v1526_v60  ;;  %v1532_v62 = vld [vmem:[#allocation2 + $0x1f8] sm:$0xff]  ;;  %v1534_v63 = vld [vmem:[#allocation2 + $0x1f0] sm:$0xff] }
  0x29   :  { %2151 = vst [vmem:[#allocation13_spill] sm:$0xff] %v1528_v61  ;;  %2152 = vst [vmem:[#allocation14_spill] sm:$0xff] %v1532_v62 }
  0x2a   :  { %2153 = vst [vmem:[#allocation15_spill] sm:$0xff] %v1534_v63 }
  0x2c   :  { %116 = vadd.xlane.f32.xlu1 %v1382_v12  ;;  %114 = vadd.xlane.f32.xlu0 %v1384_v13 }
  0x30   :  { %120 = vadd.xlane.f32.xlu1 %v1388_v14  ;;  %118 = vadd.xlane.f32.xlu0 %v1390_v15 }
  0x34   :  { %124 = vadd.xlane.f32.xlu1 %v1394_v16  ;;  %122 = vadd.xlane.f32.xlu0 %v1396_v17 }
  0x38   :  { %128 = vadd.xlane.f32.xlu1 %v1400_v18  ;;  %126 = vadd.xlane.f32.xlu0 %v1402_v19 }
  0x3c   :  { %132 = vadd.xlane.f32.xlu1 %v1406_v20  ;;  %130 = vadd.xlane.f32.xlu0 %v1408_v21 }
  0x40   :  { %136 = vadd.xlane.f32.xlu1 %v1412_v22  ;;  %134 = vadd.xlane.f32.xlu0 %v1414_v23 }
  0x44   :  { %140 = vadd.xlane.f32.xlu1 %v1418_v24  ;;  %138 = vadd.xlane.f32.xlu0 %v1420_v25 }
  0x48   :  { %144 = vadd.xlane.f32.xlu1 %v1424_v26  ;;  %142 = vadd.xlane.f32.xlu0 %v1426_v27 }
  0x4c   :  { %148 = vadd.xlane.f32.xlu1 %v1430_v28  ;;  %146 = vadd.xlane.f32.xlu0 %v1432_v29 }
  0x50   :  { %152 = vadd.xlane.f32.xlu1 %v1436_v30  ;;  %150 = vadd.xlane.f32.xlu0 %v1438_v31 }
  0x54   :  { %156 = vadd.xlane.f32.xlu1 %v1442_v32  ;;  %154 = vadd.xlane.f32.xlu0 %v1444_v33 }
  0x58   :  { %160 = vadd.xlane.f32.xlu1 %v1448_v34  ;;  %158 = vadd.xlane.f32.xlu0 %v1450_v35 }
  0x5c   :  { %164 = vadd.xlane.f32.xlu1 %v1454_v36  ;;  %162 = vadd.xlane.f32.xlu0 %v1456_v37 }
  0x60   :  { %168 = vadd.xlane.f32.xlu1 %v1460_v38  ;;  %166 = vadd.xlane.f32.xlu0 %v1462_v39 }
  0x64   :  { %172 = vadd.xlane.f32.xlu1 %v1466_v40  ;;  %170 = vadd.xlane.f32.xlu0 %v1468_v41 }
  0x68   :  { %176 = vadd.xlane.f32.xlu1 %v1472_v42  ;;  %174 = vadd.xlane.f32.xlu0 %v1474_v43 }
  0x6c   :  { %180 = vadd.xlane.f32.xlu1 %v1478_v44  ;;  %178 = vadd.xlane.f32.xlu0 %v1480_v45 }
  0x70   :  { %184 = vadd.xlane.f32.xlu1 %v1484_v46  ;;  %182 = vadd.xlane.f32.xlu0 %v1486_v47 }
  0x74   :  { %188 = vadd.xlane.f32.xlu1 %v1490_v48  ;;  %186 = vadd.xlane.f32.xlu0 %v1492_v49 }
  0x78   :  { %192 = vadd.xlane.f32.xlu1 %v1496_v50  ;;  %190 = vadd.xlane.f32.xlu0 %v1498_v51 }
  0x7c   :  { %196 = vadd.xlane.f32.xlu1 %v1502_v52  ;;  %194 = vadd.xlane.f32.xlu0 %v1504_v53 }
  0x80   :  { %200 = vadd.xlane.f32.xlu1 %v1508_v54  ;;  %198 = vadd.xlane.f32.xlu0 %v1510_v55 }
  0x84   :  { %204 = vadd.xlane.f32.xlu1 %v1514_v56  ;;  %202 = vadd.xlane.f32.xlu0 %v1516_v57 }
  0x88   :  { %208 = vadd.xlane.f32.xlu1 %v1520_v58  ;;  %206 = vadd.xlane.f32.xlu0 %v1522_v59  ;;  %v219_v58 = vmul.f32 %v1354_v3, %v1354_v3  ;;  %v218_v59 = vmul.f32 %v1348_v1, %v1348_v1 }
  0x8c   :  { %212 = vadd.xlane.f32.xlu1 %v1526_v60  ;;  %210 = vadd.xlane.f32.xlu0 %v1528_v61  ;;  %v221_v60 = vmul.f32 %v1352_v2, %v1352_v2  ;;  %v220_v61 = vmul.f32 %v1346_v0, %v1346_v0 }
  0x90   :  { %216 = vadd.xlane.f32.xlu1 %v1532_v62  ;;  %214 = vadd.xlane.f32.xlu0 %v1534_v63  ;;  %v223_v62 = vmul.f32 %v1358_v4, %v1358_v4  ;;  %v222_v63 = vmul.f32 %v1360_v5, %v1360_v5 }
  0x94   :  { %284 = vadd.xlane.f32.xlu1 %v219_v58  ;;  %282 = vadd.xlane.f32.xlu0 %v218_v59  ;;  %v225_v58 = vmul.f32 %v1364_v6, %v1364_v6  ;;  %v224_v59 = vmul.f32 %v1366_v7, %v1366_v7 }
  0x98   :  { %288 = vadd.xlane.f32.xlu1 %v221_v60  ;;  %286 = vadd.xlane.f32.xlu0 %v220_v61  ;;  %v227_v60 = vmul.f32 %v1370_v8, %v1370_v8  ;;  %v226_v61 = vmul.f32 %v1372_v9, %v1372_v9  ;;  %v231_v8 = vmul.f32 %v1382_v12, %v1382_v12 }
  0x99   :  { %v230_v9 = vmul.f32 %v1384_v13, %v1384_v13  ;;  %v235_v12 = vmul.f32 %v1394_v16, %v1394_v16  ;;  %v234_v13 = vmul.f32 %v1396_v17, %v1396_v17  ;;  %v239_v16 = vmul.f32 %v1406_v20, %v1406_v20 }
  0x9a   :  { %v238_v17 = vmul.f32 %v1408_v21, %v1408_v21  ;;  %v243_v20 = vmul.f32 %v1418_v24, %v1418_v24  ;;  %v242_v21 = vmul.f32 %v1420_v25, %v1420_v25  ;;  %v247_v24 = vmul.f32 %v1430_v28, %v1430_v28 }
  0x9b   :  { %v246_v25 = vmul.f32 %v1432_v29, %v1432_v29  ;;  %v251_v28 = vmul.f32 %v1442_v32, %v1442_v32  ;;  %v250_v29 = vmul.f32 %v1444_v33, %v1444_v33  ;;  %v255_v32 = vmul.f32 %v1454_v36, %v1454_v36 }
  0x9c   :  { %292 = vadd.xlane.f32.xlu1 %v223_v62  ;;  %290 = vadd.xlane.f32.xlu0 %v222_v63  ;;  %v229_v62 = vmul.f32 %v1376_v10, %v1376_v10  ;;  %v228_v63 = vmul.f32 %v1378_v11, %v1378_v11  ;;  %v233_v10 = vmul.f32 %v1388_v14, %v1388_v14 }
  0x9d   :  { %v232_v11 = vmul.f32 %v1390_v15, %v1390_v15  ;;  %v237_v14 = vmul.f32 %v1400_v18, %v1400_v18  ;;  %v236_v15 = vmul.f32 %v1402_v19, %v1402_v19  ;;  %v241_v18 = vmul.f32 %v1412_v22, %v1412_v22 }
  0x9e   :  { %v240_v19 = vmul.f32 %v1414_v23, %v1414_v23  ;;  %v245_v22 = vmul.f32 %v1424_v26, %v1424_v26  ;;  %v244_v23 = vmul.f32 %v1426_v27, %v1426_v27  ;;  %v249_v26 = vmul.f32 %v1436_v30, %v1436_v30 }
  0x9f   :  { %v248_v27 = vmul.f32 %v1438_v31, %v1438_v31  ;;  %v253_v30 = vmul.f32 %v1448_v34, %v1448_v34  ;;  %v252_v31 = vmul.f32 %v1450_v35, %v1450_v35  ;;  %v254_v33 = vmul.f32 %v1456_v37, %v1456_v37 }
  0xa0   :  { %296 = vadd.xlane.f32.xlu1 %v225_v58  ;;  %294 = vadd.xlane.f32.xlu0 %v224_v59  ;;  %v257_v34 = vmul.f32 %v1460_v38, %v1460_v38  ;;  %v256_v35 = vmul.f32 %v1462_v39, %v1462_v39  ;;  %v259_v36 = vmul.f32 %v1466_v40, %v1466_v40 }
  0xa1   :  { %v1558_v4 = vpop.xlane.xlu1 %94  ;;  %v1560_v0 = vpop.xlane.xlu0 %90  ;;  %v258_v37 = vmul.f32 %v1468_v41, %v1468_v41  ;;  %v261_v38 = vmul.f32 %v1472_v42, %v1472_v42  ;;  %v260_v39 = vmul.f32 %v1474_v43, %v1474_v43  ;;  %v263_v40 = vmul.f32 %v1478_v44, %v1478_v44 }
  0xa2   :  { %v262_v41 = vmul.f32 %v1480_v45, %v1480_v45  ;;  %v265_v42 = vmul.f32 %v1484_v46, %v1484_v46  ;;  %v264_v43 = vmul.f32 %v1486_v47, %v1486_v47  ;;  %v267_v44 = vmul.f32 %v1490_v48, %v1490_v48 }
  0xa3   :  { %v266_v45 = vmul.f32 %v1492_v49, %v1492_v49  ;;  %v269_v46 = vmul.f32 %v1496_v50, %v1496_v50  ;;  %v268_v47 = vmul.f32 %v1498_v51, %v1498_v51  ;;  %v271_v48 = vmul.f32 %v1502_v52, %v1502_v52 }
  0xa4   :  { %300 = vadd.xlane.f32.xlu1 %v227_v60  ;;  %298 = vadd.xlane.f32.xlu0 %v226_v61  ;;  %v270_v49 = vmul.f32 %v1504_v53, %v1504_v53  ;;  %v273_v50 = vmul.f32 %v1508_v54, %v1508_v54  ;;  %v272_v51 = vmul.f32 %v1510_v55, %v1510_v55  ;;  %v2161_v54 = vld [vmem:[#allocation10_spill] sm:$0xff] }
  0xa5   :  { %v1566_v58 = vpop.xlane.xlu1 %96  ;;  %v1568_v59 = vpop.xlane.xlu0 %92  ;;  %v275_v52 = vmul.f32 %v1514_v56, %v1514_v56  ;;  %v274_v53 = vmul.f32 %v1516_v57, %v1516_v57  ;;  %v277_v55 = vmul.f32 %v2161_v54, %v2161_v54  ;;  %v2165_v56 = vld [vmem:[#allocation12_spill] sm:$0xff]  ;;  %v2169_v54 = vld [vmem:[#allocation14_spill] sm:$0xff] }
  0xa6   :  { %v279_v57 = vmul.f32 %v2165_v56, %v2165_v56 }
  0xa8   :  { %304 = vadd.xlane.f32.xlu1 %v229_v62  ;;  %302 = vadd.xlane.f32.xlu0 %v228_v63 }
  0xa9   :  { %v1574_v60 = vpop.xlane.xlu1 %100  ;;  %v1576_v61 = vpop.xlane.xlu0 %98 }
  0xac   :  { %308 = vadd.xlane.f32.xlu1 %v231_v8  ;;  %306 = vadd.xlane.f32.xlu0 %v230_v9 }
  0xad   :  { %v1582_v62 = vpop.xlane.xlu1 %104  ;;  %v1584_v63 = vpop.xlane.xlu0 %102 }
  0xb0   :  { %312 = vadd.xlane.f32.xlu1 %v233_v10  ;;  %310 = vadd.xlane.f32.xlu0 %v232_v11 }
  0xb1   :  { %v1590_v8 = vpop.xlane.xlu1 %108  ;;  %v1592_v9 = vpop.xlane.xlu0 %106 }
  0xb4   :  { %316 = vadd.xlane.f32.xlu1 %v235_v12  ;;  %314 = vadd.xlane.f32.xlu0 %v234_v13 }
  0xb5   :  { %v1598_v10 = vpop.xlane.xlu1 %112  ;;  %v1600_v11 = vpop.xlane.xlu0 %110 }
  0xb8   :  { %320 = vadd.xlane.f32.xlu1 %v237_v14  ;;  %318 = vadd.xlane.f32.xlu0 %v236_v15 }
  0xb9   :  { %v1606_v12 = vpop.xlane.xlu1 %116  ;;  %v1608_v13 = vpop.xlane.xlu0 %114 }
  0xbc   :  { %324 = vadd.xlane.f32.xlu1 %v239_v16  ;;  %322 = vadd.xlane.f32.xlu0 %v238_v17 }
  0xbd   :  { %v1614_v14 = vpop.xlane.xlu1 %120  ;;  %v1616_v15 = vpop.xlane.xlu0 %118 }
  0xc0   :  { %328 = vadd.xlane.f32.xlu1 %v241_v18  ;;  %326 = vadd.xlane.f32.xlu0 %v240_v19 }
  0xc1   :  { %v1622_v16 = vpop.xlane.xlu1 %124  ;;  %v1624_v17 = vpop.xlane.xlu0 %122 }
  0xc4   :  { %332 = vadd.xlane.f32.xlu1 %v243_v20  ;;  %330 = vadd.xlane.f32.xlu0 %v242_v21 }
  0xc5   :  { %v1630_v18 = vpop.xlane.xlu1 %128  ;;  %v1632_v19 = vpop.xlane.xlu0 %126 }
  0xc8   :  { %336 = vadd.xlane.f32.xlu1 %v245_v22  ;;  %334 = vadd.xlane.f32.xlu0 %v244_v23 }
  0xc9   :  { %v1638_v20 = vpop.xlane.xlu1 %132  ;;  %v1640_v21 = vpop.xlane.xlu0 %130 }
  0xcc   :  { %340 = vadd.xlane.f32.xlu1 %v247_v24  ;;  %338 = vadd.xlane.f32.xlu0 %v246_v25 }
  0xcd   :  { %v1646_v22 = vpop.xlane.xlu1 %136  ;;  %v1648_v23 = vpop.xlane.xlu0 %134 }
  0xd0   :  { %344 = vadd.xlane.f32.xlu1 %v249_v26  ;;  %342 = vadd.xlane.f32.xlu0 %v248_v27 }
  0xd1   :  { %v1654_v24 = vpop.xlane.xlu1 %140  ;;  %v1656_v25 = vpop.xlane.xlu0 %138 }
  0xd4   :  { %348 = vadd.xlane.f32.xlu1 %v251_v28  ;;  %346 = vadd.xlane.f32.xlu0 %v250_v29 }
  0xd5   :  { %v1662_v26 = vpop.xlane.xlu1 %144  ;;  %v1664_v27 = vpop.xlane.xlu0 %142 }
  0xd8   :  { %352 = vadd.xlane.f32.xlu1 %v253_v30  ;;  %350 = vadd.xlane.f32.xlu0 %v252_v31 }
  0xd9   :  { %v1670_v28 = vpop.xlane.xlu1 %148  ;;  %v1672_v29 = vpop.xlane.xlu0 %146 }
  0xdc   :  { %356 = vadd.xlane.f32.xlu1 %v255_v32  ;;  %354 = vadd.xlane.f32.xlu0 %v254_v33 }
  0xdd   :  { %v1678_v30 = vpop.xlane.xlu1 %152  ;;  %v1680_v31 = vpop.xlane.xlu0 %150 }
  0xe0   :  { %360 = vadd.xlane.f32.xlu1 %v257_v34  ;;  %358 = vadd.xlane.f32.xlu0 %v256_v35 }
  0xe1   :  { %v1686_v32 = vpop.xlane.xlu1 %156  ;;  %v1688_v33 = vpop.xlane.xlu0 %154 }
  0xe4   :  { %364 = vadd.xlane.f32.xlu1 %v259_v36  ;;  %362 = vadd.xlane.f32.xlu0 %v258_v37 }
  0xe5   :  { %v1694_v34 = vpop.xlane.xlu1 %160  ;;  %v1696_v35 = vpop.xlane.xlu0 %158 }
  0xe8   :  { %368 = vadd.xlane.f32.xlu1 %v261_v38  ;;  %366 = vadd.xlane.f32.xlu0 %v260_v39 }
  0xe9   :  { %v1702_v36 = vpop.xlane.xlu1 %164  ;;  %v1704_v37 = vpop.xlane.xlu0 %162 }
  0xec   :  { %372 = vadd.xlane.f32.xlu1 %v263_v40  ;;  %370 = vadd.xlane.f32.xlu0 %v262_v41 }
  0xed   :  { %v1710_v38 = vpop.xlane.xlu1 %168  ;;  %v1712_v39 = vpop.xlane.xlu0 %166 }
  0xf0   :  { %376 = vadd.xlane.f32.xlu1 %v265_v42  ;;  %374 = vadd.xlane.f32.xlu0 %v264_v43 }
  0xf1   :  { %v1718_v40 = vpop.xlane.xlu1 %172  ;;  %v1720_v41 = vpop.xlane.xlu0 %170 }
  0xf4   :  { %380 = vadd.xlane.f32.xlu1 %v267_v44  ;;  %378 = vadd.xlane.f32.xlu0 %v266_v45 }
  0xf5   :  { %v1726_v42 = vpop.xlane.xlu1 %176  ;;  %v1728_v43 = vpop.xlane.xlu0 %174 }
  0xf6   :  { %2154 = vst [vmem:[#allocation16_spill] sm:$0xff] %v1728_v43 }
  0xf8   :  { %384 = vadd.xlane.f32.xlu1 %v269_v46  ;;  %382 = vadd.xlane.f32.xlu0 %v268_v47 }
  0xf9   :  { %v1734_v44 = vpop.xlane.xlu1 %180  ;;  %v1736_v45 = vpop.xlane.xlu0 %178 }
  0xfa   :  { %2155 = vst [vmem:[#allocation17_spill] sm:$0xff] %v1734_v44  ;;  %2156 = vst [vmem:[#allocation18_spill] sm:$0xff] %v1736_v45 }
  0xfc   :  { %388 = vadd.xlane.f32.xlu1 %v271_v48  ;;  %386 = vadd.xlane.f32.xlu0 %v270_v49 }
  0xfd   :  { %v1742_v46 = vpop.xlane.xlu1 %184  ;;  %v1744_v47 = vpop.xlane.xlu0 %182 }
  0xfe   :  { %2157 = vst [vmem:[#allocation19_spill] sm:$0xff] %v1742_v46  ;;  %2158 = vst [vmem:[#allocation20_spill] sm:$0xff] %v1744_v47  ;;  %v2162_v46 = vld [vmem:[#allocation11_spill] sm:$0xff] }
  0xff   :  { %v276_v47 = vmul.f32 %v2162_v46, %v2162_v46  ;;  %v281_v46 = vmul.f32 %v2169_v54, %v2169_v54  ;;  %v410_v54 = vmul.f32 0.0078125, %v1560_v0  ;;  %v419_v0 = vmul.f32 0.0078125, %v1590_v8 }
 0x100   :  { %392 = vadd.xlane.f32.xlu1 %v273_v50  ;;  %390 = vadd.xlane.f32.xlu0 %v272_v51  ;;  %v422_v8 = vmul.f32 0.0078125, %v1608_v13  ;;  %v429_v13 = vmul.f32 0.0078125, %v1630_v18 }
 0x101   :  { %v1750_v48 = vpop.xlane.xlu1 %188  ;;  %v1752_v49 = vpop.xlane.xlu0 %186 }
 0x102   :  { %2159 = vst [vmem:[#allocation21_spill] sm:$0xff] %v1750_v48  ;;  %2160 = vst [vmem:[#allocation22_spill] sm:$0xff] %v1752_v49  ;;  %v2166_v48 = vld [vmem:[#allocation13_spill] sm:$0xff] }
 0x103   :  { %v278_v49 = vmul.f32 %v2166_v48, %v2166_v48 }
 0x104   :  { %396 = vadd.xlane.f32.xlu1 %v275_v52  ;;  %394 = vadd.xlane.f32.xlu0 %v274_v53 }
 0x105   :  { %v1758_v50 = vpop.xlane.xlu1 %192  ;;  %v1760_v51 = vpop.xlane.xlu0 %190 }
 0x106   :  { %2163 = vst [vmem:[#allocation10_spill] sm:$0xff] %v1758_v50  ;;  %2164 = vst [vmem:[#allocation11_spill] sm:$0xff] %v1760_v51  ;;  %v2170_v50 = vld [vmem:[#allocation15_spill] sm:$0xff] }
 0x107   :  { %v280_v51 = vmul.f32 %v2170_v50, %v2170_v50  ;;  %v413_v50 = vmul.f32 0.0078125, %v1566_v58  ;;  %v538_v58 = vmul.f32 %v410_v54, %v410_v54 }
 0x108   :  { %400 = vadd.xlane.f32.xlu1 %v277_v55  ;;  %398 = vadd.xlane.f32.xlu0 %v276_v47 }
 0x109   :  { %v1766_v52 = vpop.xlane.xlu1 %196  ;;  %v1768_v53 = vpop.xlane.xlu0 %194 }
 0x10a   :  { %2167 = vst [vmem:[#allocation12_spill] sm:$0xff] %v1766_v52  ;;  %2168 = vst [vmem:[#allocation13_spill] sm:$0xff] %v1768_v53 }
 0x10c   :  { %404 = vadd.xlane.f32.xlu1 %v279_v57  ;;  %402 = vadd.xlane.f32.xlu0 %v278_v49  ;;  %v412_v49 = vmul.f32 0.0078125, %v1558_v4  ;;  %v418_v4 = vmul.f32 0.0078125, %v1592_v9  ;;  %v425_v9 = vmul.f32 0.0078125, %v1614_v14  ;;  %v428_v14 = vmul.f32 0.0078125, %v1632_v19 }
 0x10d   :  { %v1774_v55 = vpop.xlane.xlu1 %200  ;;  %v1776_v47 = vpop.xlane.xlu0 %198 }
 0x10e   :  { %2171 = vst [vmem:[#allocation14_spill] sm:$0xff] %v1774_v55  ;;  %2172 = vst [vmem:[#allocation15_spill] sm:$0xff] %v1776_v47  ;;  %v411_v55 = vmul.f32 0.0078125, %v1568_v59  ;;  %v415_v47 = vmul.f32 0.0078125, %v1574_v60  ;;  %v1802_v59 = vmul.f32 %v413_v50, %v413_v50 }
 0x110   :  { %408 = vadd.xlane.f32.xlu1 %v281_v46  ;;  %406 = vadd.xlane.f32.xlu0 %v280_v51  ;;  %v414_v51 = vmul.f32 0.0078125, %v1576_v61  ;;  %v417_v46 = vmul.f32 0.0078125, %v1582_v62  ;;  %v539_v60 = vmul.f32 %v411_v55, %v411_v55  ;;  %v421_v61 = vmul.f32 0.0078125, %v1598_v10 }
 0x111   :  { %v1778_v56 = vpop.xlane.xlu1 %204  ;;  %v1780_v48 = vpop.xlane.xlu0 %202  ;;  %v1805_v53 = vmul.f32 %v415_v47, %v415_v47  ;;  %v1821_v10 = vmul.f32 %v419_v0, %v419_v0  ;;  %v1823_v47 = vmul.f32 %v418_v4, %v418_v4  ;;  %v431_v0 = vmul.f32 0.0078125, %v1638_v20 }
 0x112   :  { %2173 = vst [vmem:[#allocation23_spill] sm:$0xff] %v1778_v56  ;;  %2174 = vst [vmem:[#allocation24_spill] sm:$0xff] %v1780_v48  ;;  %v416_v48 = vmul.f32 0.0078125, %v1584_v63  ;;  %v1807_v62 = vmul.f32 %v414_v51, %v414_v51  ;;  %v420_v63 = vmul.f32 0.0078125, %v1600_v11  ;;  %v424_v11 = vmul.f32 0.0078125, %v1616_v15 }
 0x113   :  { %v1827_v50 = vmul.f32 %v421_v61, %v421_v61  ;;  %v430_v4 = vmul.f32 0.0078125, %v1640_v21  ;;  %v1840_v15 = vmul.f32 %v425_v9, %v425_v9  ;;  %v1850_v20 = vmul.f32 %v429_v13, %v429_v13 }
 0x114   :  { %v1832_v51 = vmul.f32 %v420_v63, %v420_v63  ;;  %v1852_v21 = vmul.f32 %v428_v14, %v428_v14  ;;  %v1855_v9 = vmul.f32 %v431_v0, %v431_v0 }
 0x115   :  { %v1782_v52 = vpop.xlane.xlu1 %208  ;;  %v1784_v57 = vpop.xlane.xlu0 %206 }
 0x116   :  { %2175 = vst [vmem:[#allocation25_spill] sm:$0xff] %v1782_v52  ;;  %2176 = vst [vmem:[#allocation26_spill] sm:$0xff] %v1784_v57  ;;  %v1798_v57 = vmul.f32 %v412_v49, %v412_v49  ;;  %v1811_v49 = vmul.f32 %v417_v46, %v417_v46 }
 0x117   :  { %2181 = vst [vmem:[#allocation31_spill] sm:$0xff] %v1852_v21 }
 0x119   :  { %v1794_v56 = vpop.xlane.xlu1 %212  ;;  %v1796_v52 = vpop.xlane.xlu0 %210 }
 0x11a   :  { %2177 = vst [vmem:[#allocation27_spill] sm:$0xff] %v1794_v56  ;;  %2178 = vst [vmem:[#allocation28_spill] sm:$0xff] %v1796_v52  ;;  %v423_v52 = vmul.f32 0.0078125, %v1606_v12  ;;  %v1813_v56 = vmul.f32 %v416_v48, %v416_v48  ;;  %v427_v12 = vmul.f32 0.0078125, %v1622_v16  ;;  %v426_v48 = vmul.f32 0.0078125, %v1624_v17 }
 0x11b   :  { %v433_v16 = vmul.f32 0.0078125, %v1646_v22  ;;  %v432_v17 = vmul.f32 0.0078125, %v1648_v23  ;;  %v1857_v22 = vmul.f32 %v430_v4, %v430_v4  ;;  %v436_v4 = vmul.f32 0.0078125, %v1664_v27 }
 0x11c   :  { %v1834_v46 = vmul.f32 %v423_v52, %v423_v52  ;;  %v1846_v19 = vmul.f32 %v427_v12, %v427_v12  ;;  %v1848_v45 = vmul.f32 %v426_v48, %v426_v48  ;;  %v437_v48 = vmul.f32 0.0078125, %v1662_v26 }
 0x11d   :  { %v1817_v54 = vpop.xlane.xlu1 %216  ;;  %v1819_v55 = vpop.xlane.xlu0 %214  ;;  %v1861_v12 = vmul.f32 %v432_v17, %v432_v17 }
 0x11e   :  { %2179 = vst [vmem:[#allocation29_spill] sm:$0xff] %v1817_v54  ;;  %2180 = vst [vmem:[#allocation30_spill] sm:$0xff] %v1819_v55  ;;  %v1838_v55 = vmul.f32 %v422_v8, %v422_v8  ;;  %v1844_v54 = vmul.f32 %v424_v11, %v424_v11  ;;  %v435_v8 = vmul.f32 0.0078125, %v1654_v24  ;;  %v1859_v11 = vmul.f32 %v433_v16, %v433_v16 }
 0x120   :  { %v1865_v0 = vmul.f32 %v435_v8, %v435_v8  ;;  %v440_v8 = vmul.f32 0.0078125, %v1680_v31 }
 0x121   :  { %v285_v61 = vpop.xlane.xlu1 %284  ;;  %v283_v18 = vpop.xlane.xlu0 %282 }
 0x122   :  { %v475_v52 = vmul.f32 0.0078125, %v285_v61  ;;  %v474_v63 = vmul.f32 0.0078125, %v283_v18  ;;  %v434_v61 = vmul.f32 0.0078125, %v1656_v25  ;;  %v1887_v31 = vmul.f32 %v440_v8, %v440_v8 }
 0x124   :  { %v603_v23 = vsub.f32 %v475_v52, %v539_v60  ;;  %v602_v44 = vsub.f32 %v474_v63, %v538_v58  ;;  %v439_v58 = vmul.f32 0.0078125, %v1670_v28  ;;  %v438_v60 = vmul.f32 0.0078125, %v1672_v29 }
 0x125   :  { %v289_v13 = vpop.xlane.xlu1 %288  ;;  %v287_v18 = vpop.xlane.xlu0 %286  ;;  %v1872_v52 = vmul.f32 %v434_v61, %v434_v61  ;;  %v1874_v63 = vmul.f32 %v437_v48, %v437_v48 }
 0x126   :  { %v667_v14 = vmax.f32 %v603_v23, 0.0  ;;  %v666_v21 = vmax.f32 %v602_v44, 0.0  ;;  %v477_v43 = vmul.f32 0.0078125, %v289_v13  ;;  %v476_v24 = vmul.f32 0.0078125, %v287_v18 }
 0x127   :  { %v441_v44 = vmul.f32 0.0078125, %v1678_v30  ;;  %v1878_v18 = vmul.f32 %v436_v4, %v436_v4 }
 0x128   :  { %v731_v16 = vadd.f32 1e-05, %v667_v14  ;;  %v730_v17 = vadd.f32 1e-05, %v666_v21  ;;  %v605_v25 = vsub.f32 %v477_v43, %v1802_v59  ;;  %v604_v26 = vsub.f32 %v476_v24, %v1798_v57 }
 0x129   :  { %v293_v23 = vpop.xlane.xlu1 %292  ;;  %v291_v27 = vpop.xlane.xlu0 %290  ;;  %v1880_v21 = vmul.f32 %v439_v58, %v439_v58  ;;  %v1882_v57 = vmul.f32 %v438_v60, %v438_v60  ;;  %v1885_v48 = vmul.f32 %v441_v44, %v441_v44  ;;  %v443_v14 = vmul.f32 0.0078125, %v1686_v32 }
 0x12a   :  { %1079 = vrsqrt.f32 %v731_v16  ;;  %v669_v28 = vmax.f32 %v605_v25, 0.0  ;;  %v668_v13 = vmax.f32 %v604_v26, 0.0  ;;  %v479_v29 = vmul.f32 0.0078125, %v293_v23 }
 0x12b   :  { %1081 = vrsqrt.f32 %v730_v17  ;;  %v478_v43 = vmul.f32 0.0078125, %v291_v27  ;;  %v442_v60 = vmul.f32 0.0078125, %v1688_v33  ;;  %v445_v26 = vmul.f32 0.0078125, %v1694_v34 }
 0x12c   :  { %v733_v59 = vadd.f32 1e-05, %v669_v28  ;;  %v732_v61 = vadd.f32 1e-05, %v668_v13  ;;  %v607_v30 = vsub.f32 %v479_v29, %v1805_v53  ;;  %v444_v44 = vmul.f32 0.0078125, %v1696_v35 }
 0x12d   :  { %v606_v24 = vsub.f32 %v478_v43, %v1807_v62  ;;  %v297_v4 = vpop.xlane.xlu1 %296  ;;  %v295_v16 = vpop.xlane.xlu0 %294  ;;  %v1896_v62 = vmul.f32 %v443_v14, %v443_v14  ;;  %v447_v27 = vmul.f32 0.0078125, %v1702_v36  ;;  %v446_v28 = vmul.f32 0.0078125, %v1704_v37  ;;  %v1909_v36 = vld [vmem:[%s2136_s1] ss:$0 sm:$0xff] }
 0x12e   :  { %1083 = vrsqrt.f32 %v733_v59  ;;  %v671_v58 = vmax.f32 %v607_v30, 0.0  ;;  %v481_v17 = vmul.f32 0.0078125, %v297_v4  ;;  %v480_v25 = vmul.f32 0.0078125, %v295_v16 }
 0x12f   :  { %1085 = vrsqrt.f32 %v732_v61  ;;  %v670_v53 = vmax.f32 %v606_v24, 0.0  ;;  %v1900_v61 = vmul.f32 %v442_v60, %v442_v60  ;;  %v1902_v35 = vmul.f32 %v445_v26, %v445_v26 }
 0x130   :  { %v735_v8 = vadd.f32 1e-05, %v671_v58  ;;  %v609_v23 = vsub.f32 %v481_v17, %v1811_v49  ;;  %v608_v32 = vsub.f32 %v480_v25, %v1813_v56  ;;  %v1904_v30 = vmul.f32 %v444_v44, %v444_v44 }
 0x131   :  { %v734_v13 = vadd.f32 1e-05, %v670_v53  ;;  %v301_v29 = vpop.xlane.xlu1 %300  ;;  %v299_v33 = vpop.xlane.xlu0 %298  ;;  %v1912_v16 = vmul.f32 %v447_v27, %v447_v27  ;;  %v1914_v58 = vmul.f32 %v446_v28, %v446_v28  ;;  %v449_v28 = vmul.f32 0.0078125, %v1710_v38 }
 0x132   :  { %1087 = vrsqrt.f32 %v735_v8  ;;  %v673_v34 = vmax.f32 %v609_v23, 0.0  ;;  %v672_v43 = vmax.f32 %v608_v32, 0.0  ;;  %v483_v59 = vmul.f32 0.0078125, %v301_v29 }
 0x133   :  { %1089 = vrsqrt.f32 %v734_v13  ;;  %v482_v49 = vmul.f32 0.0078125, %v299_v33  ;;  %v448_v33 = vmul.f32 0.0078125, %v1712_v39 }
 0x134   :  { %v1080_v56 = vpop.eup %1079  ;;  %v737_v37 = vadd.f32 1e-05, %v673_v34  ;;  %v736_v14 = vadd.f32 1e-05, %v672_v43  ;;  %v611_v24 = vsub.f32 %v483_v59, %v1821_v10 }
 0x135   :  { %v1082_v4 = vpop.eup %1081  ;;  %v860_v17 = vmul.f32 %v1080_v56, %v1354_v3  ;;  %v610_v25 = vsub.f32 %v482_v49, %v1823_v47  ;;  %v305_v60 = vpop.xlane.xlu1 %304  ;;  %v2182_v56 = vld [vmem:[#allocation8_spill] sm:$0xff] }
 0x136   :  { %v303_v26 = vpop.xlane.xlu0 %302  ;;  %v859_v53 = vmul.f32 %v1082_v4, %v1348_v1  ;;  %1091 = vrsqrt.f32 %v737_v37  ;;  %v675_v44 = vmax.f32 %v611_v24, 0.0  ;;  %v485_v8 = vmul.f32 0.0078125, %v305_v60 }
 0x137   :  { %v930_v23 = vmul.f32 %v1909_v36, %v860_v17  ;;  %1093 = vrsqrt.f32 %v736_v14  ;;  %v674_v10 = vmax.f32 %v610_v25, 0.0  ;;  %v484_v32 = vmul.f32 0.0078125, %v303_v26 }
 0x138   :  { %v1084_v27 = vpop.eup %1083  ;;  %v929_v13 = vmul.f32 %v1909_v36, %v859_v53  ;;  %v739_v3 = vadd.f32 1e-05, %v675_v44  ;;  %v613_v47 = vsub.f32 %v485_v8, %v1827_v50  ;;  %v1928_v17 = vmul.f32 %v449_v28, %v449_v28  ;;  %v2183_v53 = vld [vmem:[#allocation9_spill] sm:$0xff] }
 0x139   :  { %v1086_v29 = vpop.eup %1085  ;;  %994 = vst [vmem:[#allocation5 + $0x8] sm:$0xff] %v930_v23  ;;  %v862_v1 = vmul.f32 %v1084_v27, %v1352_v2  ;;  %v738_v34 = vadd.f32 1e-05, %v674_v10  ;;  %v612_v43 = vsub.f32 %v484_v32, %v1832_v51  ;;  %v309_v59 = vpop.xlane.xlu1 %308  ;;  %v1932_v26 = vmul.f32 %v448_v33, %v448_v33 }
 0x13a   :  { %v307_v49 = vpop.xlane.xlu0 %306  ;;  %993 = vst [vmem:[#allocation5] sm:$0xff] %v929_v13  ;;  %v861_v37 = vmul.f32 %v1086_v29, %v2182_v56  ;;  %1095 = vrsqrt.f32 %v739_v3  ;;  %v677_v38 = vmax.f32 %v613_v47, 0.0  ;;  %v487_v14 = vmul.f32 0.0078125, %v309_v59 }
 0x13b   :  { %v932_v24 = vmul.f32 %v1909_v36, %v862_v1  ;;  %1097 = vrsqrt.f32 %v738_v34  ;;  %v676_v50 = vmax.f32 %v612_v43, 0.0  ;;  %v486_v4 = vmul.f32 0.0078125, %v307_v49 }
 0x13c   :  { %v1088_v39 = vpop.eup %1087  ;;  %v931_v2 = vmul.f32 %v1909_v36, %v861_v37  ;;  %v741_v25 = vadd.f32 1e-05, %v677_v38  ;;  %v615_v51 = vsub.f32 %v487_v14, %v1834_v46  ;;  %v451_v33 = vmul.f32 0.0078125, %v1718_v40 }
 0x13d   :  { %v1090_v60 = vpop.eup %1089  ;;  %996 = vst [vmem:[#allocation5 + $0x18] sm:$0xff] %v932_v24  ;;  %v864_v44 = vmul.f32 %v1088_v39, %v2183_v53  ;;  %v740_v8 = vadd.f32 1e-05, %v676_v50  ;;  %v614_v23 = vsub.f32 %v486_v4, %v1838_v55  ;;  %v313_v10 = vpop.xlane.xlu1 %312  ;;  %v450_v59 = vmul.f32 0.0078125, %v1720_v41 }
 0x13e   :  { %v311_v32 = vpop.xlane.xlu0 %310  ;;  %995 = vst [vmem:[#allocation5 + $0x10] sm:$0xff] %v931_v2  ;;  %v863_v27 = vmul.f32 %v1090_v60, %v1360_v5  ;;  %1099 = vrsqrt.f32 %v741_v25  ;;  %v679_v28 = vmax.f32 %v615_v51, 0.0  ;;  %v489_v13 = vmul.f32 0.0078125, %v313_v10  ;;  %v1208_v10 = vld [vmem:[#allocation2 + $0x40] sm:$0xff] }
 0x13f   :  { %v934_v3 = vmul.f32 %v1909_v36, %v864_v44  ;;  %1101 = vrsqrt.f32 %v740_v8  ;;  %v678_v46 = vmax.f32 %v614_v23, 0.0  ;;  %v488_v47 = vmul.f32 0.0078125, %v311_v32 }
 0x140   :  { %v1092_v29 = vpop.eup %1091  ;;  %v933_v1 = vmul.f32 %v1909_v36, %v863_v27  ;;  %v743_v34 = vadd.f32 1e-05, %v679_v28  ;;  %v617_v55 = vsub.f32 %v489_v13, %v1840_v15  ;;  %v1946_v39 = vmul.f32 %v451_v33, %v451_v33 }
 0x141   :  { %v1094_v43 = vpop.eup %1093  ;;  %998 = vst [vmem:[#allocation5 + $0x28] sm:$0xff] %v934_v3  ;;  %v866_v5 = vmul.f32 %v1092_v29, %v1364_v6  ;;  %v742_v49 = vadd.f32 1e-05, %v678_v46  ;;  %v616_v56 = vsub.f32 %v488_v47, %v1844_v54  ;;  %v317_v37 = vpop.xlane.xlu1 %316  ;;  %v1950_v51 = vmul.f32 %v450_v59, %v450_v59 }
 0x142   :  { %v315_v38 = vpop.xlane.xlu0 %314  ;;  %997 = vst [vmem:[#allocation5 + $0x20] sm:$0xff] %v933_v1  ;;  %v865_v14 = vmul.f32 %v1094_v43, %v1366_v7  ;;  %1103 = vrsqrt.f32 %v743_v34  ;;  %v681_v40 = vmax.f32 %v617_v55, 0.0  ;;  %v491_v24 = vmul.f32 0.0078125, %v317_v37  ;;  %v1207_v7 = vld [vmem:[#allocation2 + $0x48] sm:$0xff]  ;;  %v2184_v34 = vld [vmem:[#allocation16_spill] sm:$0xff]  ;;  %v1209_v43 = vld [vmem:[#allocation2 + $0x58] sm:$0xff] }
 0x143   :  { %v936_v50 = vmul.f32 %v1909_v36, %v866_v5  ;;  %1105 = vrsqrt.f32 %v742_v49  ;;  %v680_v15 = vmax.f32 %v616_v56, 0.0  ;;  %v490_v4 = vmul.f32 0.0078125, %v315_v38  ;;  %v2185_v49 = vld [vmem:[#allocation31_spill] sm:$0xff] }
 0x144   :  { %v1096_v41 = vpop.eup %1095  ;;  %v935_v6 = vmul.f32 %v1909_v36, %v865_v14  ;;  %v745_v2 = vadd.f32 1e-05, %v681_v40  ;;  %v619_v54 = vsub.f32 %v491_v24, %v1846_v19  ;;  %v453_v47 = vmul.f32 0.0078125, %v1726_v42  ;;  %v1210_v14 = vld [vmem:[#allocation2 + $0x50] sm:$0xff] }
 0x145   :  { %v1098_v25 = vpop.eup %1097  ;;  %1000 = vst [vmem:[#allocation5 + $0x38] sm:$0xff] %v936_v50  ;;  %v868_v60 = vmul.f32 %v1207_v7, %v1096_v41  ;;  %v744_v53 = vadd.f32 1e-05, %v680_v15  ;;  %v618_v44 = vsub.f32 %v490_v4, %v1848_v45  ;;  %v321_v8 = vpop.xlane.xlu1 %320  ;;  %v452_v55 = vmul.f32 0.0078125, %v2184_v34  ;;  %v2187_v34 = vld [vmem:[#allocation18_spill] sm:$0xff] }
 0x146   :  { %v319_v23 = vpop.xlane.xlu0 %318  ;;  %999 = vst [vmem:[#allocation5 + $0x30] sm:$0xff] %v935_v6  ;;  %v867_v32 = vmul.f32 %v1208_v10, %v1098_v25  ;;  %1107 = vrsqrt.f32 %v745_v2  ;;  %v683_v27 = vmax.f32 %v619_v54, 0.0  ;;  %v493_v28 = vmul.f32 0.0078125, %v321_v8 }
 0x147   :  { %v938_v13 = vmul.f32 %v1909_v36, %v868_v60  ;;  %1109 = vrsqrt.f32 %v744_v53  ;;  %v682_v19 = vmax.f32 %v618_v44, 0.0  ;;  %v492_v3 = vmul.f32 0.0078125, %v319_v23  ;;  %v1211_v60 = vld [vmem:[#allocation2 + $0x68] sm:$0xff] }
 0x148   :  { %v1100_v46 = vpop.eup %1099  ;;  %v937_v29 = vmul.f32 %v1909_v36, %v867_v32  ;;  %v747_v33 = vadd.f32 1e-05, %v683_v27  ;;  %v621_v45 = vsub.f32 %v493_v28, %v1850_v20  ;;  %v1960_v41 = vmul.f32 %v453_v47, %v453_v47  ;;  %v1212_v32 = vld [vmem:[#allocation2 + $0x60] sm:$0xff]  ;;  %v2186_v47 = vld [vmem:[#allocation17_spill] sm:$0xff] }
 0x149   :  { %v1102_v1 = vpop.eup %1101  ;;  %1002 = vst [vmem:[#allocation5 + $0x48] sm:$0xff] %v938_v13  ;;  %v870_v59 = vmul.f32 %v1209_v43, %v1100_v46  ;;  %v746_v5 = vadd.f32 1e-05, %v682_v19  ;;  %v620_v56 = vsub.f32 %v492_v3, %v2185_v49  ;;  %v325_v37 = vpop.xlane.xlu1 %324  ;;  %v1964_v7 = vmul.f32 %v452_v55, %v452_v55  ;;  %v1213_v43 = vld [vmem:[#allocation2 + $0x78] sm:$0xff] }
 0x14a   :  { %v323_v38 = vpop.xlane.xlu0 %322  ;;  %1001 = vst [vmem:[#allocation5 + $0x40] sm:$0xff] %v937_v29  ;;  %v869_v40 = vmul.f32 %v1210_v14, %v1102_v1  ;;  %1111 = vrsqrt.f32 %v747_v33  ;;  %v685_v42 = vmax.f32 %v621_v45, 0.0  ;;  %v495_v24 = vmul.f32 0.0078125, %v325_v37 }
 0x14b   :  { %v940_v50 = vmul.f32 %v1909_v36, %v870_v59  ;;  %1113 = vrsqrt.f32 %v746_v5  ;;  %v684_v20 = vmax.f32 %v620_v56, 0.0  ;;  %v494_v15 = vmul.f32 0.0078125, %v323_v38  ;;  %v1214_v38 = vld [vmem:[#allocation2 + $0x70] sm:$0xff] }
 0x14c   :  { %v1104_v4 = vpop.eup %1103  ;;  %v939_v6 = vmul.f32 %v1909_v36, %v869_v40  ;;  %v749_v2 = vadd.f32 1e-05, %v685_v42  ;;  %v623_v54 = vsub.f32 %v495_v24, %v1855_v9  ;;  %v455_v29 = vmul.f32 0.0078125, %v2186_v47 }
 0x14d   :  { %v1106_v25 = vpop.eup %1105  ;;  %1004 = vst [vmem:[#allocation5 + $0x58] sm:$0xff] %v940_v50  ;;  %v872_v53 = vmul.f32 %v1211_v60, %v1104_v4  ;;  %v748_v44 = vadd.f32 1e-05, %v684_v20  ;;  %v622_v8 = vsub.f32 %v494_v15, %v1857_v22  ;;  %v329_v23 = vpop.xlane.xlu1 %328  ;;  %v454_v55 = vmul.f32 0.0078125, %v2187_v34 }
 0x14e   :  { %v327_v10 = vpop.xlane.xlu0 %326  ;;  %1003 = vst [vmem:[#allocation5 + $0x50] sm:$0xff] %v939_v6  ;;  %v871_v27 = vmul.f32 %v1212_v32, %v1106_v25  ;;  %1115 = vrsqrt.f32 %v749_v2  ;;  %v687_v28 = vmax.f32 %v623_v54, 0.0  ;;  %v497_v13 = vmul.f32 0.0078125, %v329_v23  ;;  %v1215_v25 = vld [vmem:[#allocation2 + $0x88] sm:$0xff] }
 0x14f   :  { %v942_v19 = vmul.f32 %v1909_v36, %v872_v53  ;;  %1117 = vrsqrt.f32 %v748_v44  ;;  %v686_v9 = vmax.f32 %v622_v8, 0.0  ;;  %v496_v3 = vmul.f32 0.0078125, %v327_v10  ;;  %v1216_v10 = vld [vmem:[#allocation2 + $0x80] sm:$0xff] }
 0x150   :  { %v1108_v46 = vpop.eup %1107  ;;  %v941_v33 = vmul.f32 %v1909_v36, %v871_v27  ;;  %v751_v45 = vadd.f32 1e-05, %v687_v28  ;;  %v625_v22 = vsub.f32 %v497_v13, %v1859_v11  ;;  %v1974_v15 = vmul.f32 %v455_v29, %v455_v29 }
 0x151   :  { %v1110_v1 = vpop.eup %1109  ;;  %1006 = vst [vmem:[#allocation5 + $0x68] sm:$0xff] %v942_v19  ;;  %v874_v59 = vmul.f32 %v1213_v43, %v1108_v46  ;;  %v750_v5 = vadd.f32 1e-05, %v686_v9  ;;  %v624_v49 = vsub.f32 %v496_v3, %v1861_v12  ;;  %v333_v56 = vpop.xlane.xlu1 %332  ;;  %v1978_v54 = vmul.f32 %v454_v55, %v454_v55  ;;  %v2188_v3 = vld [vmem:[#allocation19_spill] sm:$0xff] }
 0x152   :  { %v331_v37 = vpop.xlane.xlu0 %330  ;;  %1005 = vst [vmem:[#allocation5 + $0x60] sm:$0xff] %v941_v33  ;;  %v873_v14 = vmul.f32 %v1214_v38, %v1110_v1  ;;  %1119 = vrsqrt.f32 %v751_v45  ;;  %v689_v40 = vmax.f32 %v625_v22, 0.0  ;;  %v499_v42 = vmul.f32 0.0078125, %v333_v56  ;;  %v2189_v45 = vld [vmem:[#allocation20_spill] sm:$0xff]  ;;  %v1217_v1 = vld [vmem:[#allocation2 + $0x98] sm:$0xff] }
 0x153   :  { %v944_v24 = vmul.f32 %v1909_v36, %v874_v59  ;;  %1121 = vrsqrt.f32 %v750_v5  ;;  %v688_v11 = vmax.f32 %v624_v49, 0.0  ;;  %v498_v50 = vmul.f32 0.0078125, %v331_v37  ;;  %v1218_v49 = vld [vmem:[#allocation2 + $0x90] sm:$0xff] }
 0x154   :  { %v1112_v20 = vpop.eup %1111  ;;  %v943_v4 = vmul.f32 %v1909_v36, %v873_v14  ;;  %v753_v6 = vadd.f32 1e-05, %v689_v40  ;;  %v627_v12 = vsub.f32 %v499_v42, %v1865_v0  ;;  %v457_v46 = vmul.f32 0.0078125, %v2188_v3 }
 0x155   :  { %v1114_v2 = vpop.eup %1113  ;;  %1008 = vst [vmem:[#allocation5 + $0x78] sm:$0xff] %v944_v24  ;;  %v876_v60 = vmul.f32 %v1215_v25, %v1112_v20  ;;  %v752_v53 = vadd.f32 1e-05, %v688_v11  ;;  %v626_v44 = vsub.f32 %v498_v50, %v1872_v52  ;;  %v337_v8 = vpop.xlane.xlu1 %336  ;;  %v456_v22 = vmul.f32 0.0078125, %v2189_v45 }
 0x156   :  { %v335_v23 = vpop.xlane.xlu0 %334  ;;  %1007 = vst [vmem:[#allocation5 + $0x70] sm:$0xff] %v943_v4  ;;  %v875_v32 = vmul.f32 %v1216_v10, %v1114_v2  ;;  %1123 = vrsqrt.f32 %v753_v6  ;;  %v691_v27 = vmax.f32 %v627_v12, 0.0  ;;  %v501_v28 = vmul.f32 0.0078125, %v337_v8  ;;  %v1219_v6 = vld [vmem:[#allocation2 + $0xa8] sm:$0xff] }
 0x157   :  { %v946_v13 = vmul.f32 %v1909_v36, %v876_v60  ;;  %1125 = vrsqrt.f32 %v752_v53  ;;  %v690_v0 = vmax.f32 %v626_v44, 0.0  ;;  %v500_v19 = vmul.f32 0.0078125, %v335_v23  ;;  %v1220_v44 = vld [vmem:[#allocation2 + $0xa0] sm:$0xff] }
 0x158   :  { %v1116_v9 = vpop.eup %1115  ;;  %v945_v47 = vmul.f32 %v1909_v36, %v875_v32  ;;  %v755_v29 = vadd.f32 1e-05, %v691_v27  ;;  %v629_v52 = vsub.f32 %v501_v28, %v1874_v63  ;;  %v1988_v24 = vmul.f32 %v457_v46, %v457_v46  ;;  %v2191_v46 = vld [vmem:[#allocation22_spill] sm:$0xff] }
 0x159   :  { %v1118_v33 = vpop.eup %1117  ;;  %1010 = vst [vmem:[#allocation5 + $0x88] sm:$0xff] %v946_v13  ;;  %v878_v34 = vmul.f32 %v1217_v1, %v1116_v9  ;;  %v754_v55 = vadd.f32 1e-05, %v690_v0  ;;  %v628_v43 = vsub.f32 %v500_v19, %v1878_v18  ;;  %v341_v59 = vpop.xlane.xlu1 %340  ;;  %v1992_v4 = vmul.f32 %v456_v22, %v456_v22  ;;  %v2190_v13 = vld [vmem:[#allocation21_spill] sm:$0xff] }
 0x15a   :  { %v339_v5 = vpop.xlane.xlu0 %338  ;;  %1009 = vst [vmem:[#allocation5 + $0x80] sm:$0xff] %v945_v47  ;;  %v877_v56 = vmul.f32 %v1218_v49, %v1118_v33  ;;  %1127 = vrsqrt.f32 %v755_v29  ;;  %v693_v37 = vmax.f32 %v629_v52, 0.0  ;;  %v503_v38 = vmul.f32 0.0078125, %v341_v59  ;;  %v1221_v29 = vld [vmem:[#allocation2 + $0xb8] sm:$0xff] }
 0x15b   :  { %v948_v14 = vmul.f32 %v1909_v36, %v878_v34  ;;  %1129 = vrsqrt.f32 %v754_v55  ;;  %v692_v63 = vmax.f32 %v628_v43, 0.0  ;;  %v502_v40 = vmul.f32 0.0078125, %v339_v5  ;;  %v1222_v34 = vld [vmem:[#allocation2 + $0xb0] sm:$0xff] }
 0x15c   :  { %v1120_v42 = vpop.eup %1119  ;;  %v947_v11 = vmul.f32 %v1909_v36, %v877_v56  ;;  %v757_v50 = vadd.f32 1e-05, %v693_v37  ;;  %v631_v18 = vsub.f32 %v503_v38, %v1880_v21  ;;  %v459_v0 = vmul.f32 0.0078125, %v2190_v13 }
 0x15d   :  { %v1122_v20 = vpop.eup %1121  ;;  %1012 = vst [vmem:[#allocation5 + $0x98] sm:$0xff] %v948_v14  ;;  %v880_v12 = vmul.f32 %v1219_v6, %v1120_v42  ;;  %v756_v2 = vadd.f32 1e-05, %v692_v63  ;;  %v630_v25 = vsub.f32 %v502_v40, %v1882_v57  ;;  %v345_v60 = vpop.xlane.xlu1 %344  ;;  %v458_v47 = vmul.f32 0.0078125, %v2191_v46  ;;  %v1223_v42 = vld [vmem:[#allocation2 + $0xc8] sm:$0xff] }
 0x15e   :  { %v343_v53 = vpop.xlane.xlu0 %342  ;;  %1011 = vst [vmem:[#allocation5 + $0x90] sm:$0xff] %v947_v11  ;;  %v879_v8 = vmul.f32 %v1220_v44, %v1122_v20  ;;  %1131 = vrsqrt.f32 %v757_v50  ;;  %v695_v23 = vmax.f32 %v631_v18, 0.0  ;;  %v505_v10 = vmul.f32 0.0078125, %v345_v60 }
 0x15f   :  { %v950_v32 = vmul.f32 %v1909_v36, %v880_v12  ;;  %1133 = vrsqrt.f32 %v756_v2  ;;  %v694_v21 = vmax.f32 %v630_v25, 0.0  ;;  %v504_v27 = vmul.f32 0.0078125, %v343_v53  ;;  %v1224_v12 = vld [vmem:[#allocation2 + $0xc0] sm:$0xff] }
 0x160   :  { %v1124_v28 = vpop.eup %1123  ;;  %v949_v19 = vmul.f32 %v1909_v36, %v879_v8  ;;  %v759_v9 = vadd.f32 1e-05, %v695_v23  ;;  %v633_v57 = vsub.f32 %v505_v10, %v1885_v48  ;;  %v2002_v37 = vmul.f32 %v459_v0, %v459_v0  ;;  %v2192_v23 = vld [vmem:[#allocation10_spill] sm:$0xff]  ;;  %v1225_v0 = vld [vmem:[#allocation2 + $0xd8] sm:$0xff] }
 0x161   :  { %v1126_v3 = vpop.eup %1125  ;;  %1014 = vst [vmem:[#allocation5 + $0xa8] sm:$0xff] %v950_v32  ;;  %v882_v52 = vmul.f32 %v1221_v29, %v1124_v28  ;;  %v758_v33 = vadd.f32 1e-05, %v694_v21  ;;  %v632_v45 = vsub.f32 %v504_v27, %v1887_v31  ;;  %v349_v22 = vpop.xlane.xlu1 %348  ;;  %v2006_v40 = vmul.f32 %v458_v47, %v458_v47  ;;  %v2193_v28 = vld [vmem:[#allocation11_spill] sm:$0xff]  ;;  %v1226_v47 = vld [vmem:[#allocation2 + $0xd0] sm:$0xff] }
 0x162   :  { %v347_v1 = vpop.xlane.xlu0 %346  ;;  %1013 = vst [vmem:[#allocation5 + $0xa0] sm:$0xff] %v949_v19  ;;  %v881_v55 = vmul.f32 %v1222_v34, %v1126_v3  ;;  %1135 = vrsqrt.f32 %v759_v9  ;;  %v697_v43 = vmax.f32 %v633_v57, 0.0  ;;  %v507_v59 = vmul.f32 0.0078125, %v349_v22 }
 0x163   :  { %v952_v5 = vmul.f32 %v1909_v36, %v882_v52  ;;  %1137 = vrsqrt.f32 %v758_v33  ;;  %v696_v48 = vmax.f32 %v632_v45, 0.0  ;;  %v506_v49 = vmul.f32 0.0078125, %v347_v1 }
 0x164   :  { %v1128_v56 = vpop.eup %1127  ;;  %v951_v38 = vmul.f32 %v1909_v36, %v881_v55  ;;  %v761_v14 = vadd.f32 1e-05, %v697_v43  ;;  %v635_v31 = vsub.f32 %v507_v59, %v1896_v62  ;;  %v461_v10 = vmul.f32 0.0078125, %v2192_v23 }
 0x165   :  { %v1130_v63 = vpop.eup %1129  ;;  %1016 = vst [vmem:[#allocation5 + $0xb8] sm:$0xff] %v952_v5  ;;  %v884_v11 = vmul.f32 %v1223_v42, %v1128_v56  ;;  %v760_v50 = vadd.f32 1e-05, %v696_v48  ;;  %v634_v18 = vsub.f32 %v506_v49, %v1900_v61  ;;  %v353_v20 = vpop.xlane.xlu1 %352  ;;  %v460_v13 = vmul.f32 0.0078125, %v2193_v28  ;;  %v1227_v48 = vld [vmem:[#allocation2 + $0xe8] sm:$0xff] }
 0x166   :  { %v351_v6 = vpop.xlane.xlu0 %350  ;;  %1015 = vst [vmem:[#allocation5 + $0xb0] sm:$0xff] %v951_v38  ;;  %v883_v2 = vmul.f32 %v1224_v12, %v1130_v63  ;;  %1139 = vrsqrt.f32 %v761_v14  ;;  %v699_v25 = vmax.f32 %v635_v31, 0.0  ;;  %v509_v60 = vmul.f32 0.0078125, %v353_v20  ;;  %v1228_v63 = vld [vmem:[#allocation2 + $0xe0] sm:$0xff] }
 0x167   :  { %v954_v53 = vmul.f32 %v1909_v36, %v884_v11  ;;  %1141 = vrsqrt.f32 %v760_v50  ;;  %v698_v62 = vmax.f32 %v634_v18, 0.0  ;;  %v508_v44 = vmul.f32 0.0078125, %v351_v6  ;;  %v2194_v12 = vld [vmem:[#allocation12_spill] sm:$0xff] }
 0x168   :  { %v1132_v8 = vpop.eup %1131  ;;  %v953_v32 = vmul.f32 %v1909_v36, %v883_v2  ;;  %v763_v21 = vadd.f32 1e-05, %v699_v25  ;;  %v637_v61 = vsub.f32 %v509_v60, %v1902_v35  ;;  %v2016_v34 = vmul.f32 %v461_v10, %v461_v10 }
 0x169   :  { %v1134_v27 = vpop.eup %1133  ;;  %1018 = vst [vmem:[#allocation5 + $0xc8] sm:$0xff] %v954_v53  ;;  %v886_v19 = vmul.f32 %v1225_v0, %v1132_v8  ;;  %v762_v9 = vadd.f32 1e-05, %v698_v62  ;;  %v636_v57 = vsub.f32 %v508_v44, %v1904_v30  ;;  %v357_v3 = vpop.xlane.xlu1 %356  ;;  %v2020_v5 = vmul.f32 %v460_v13, %v460_v13  ;;  %v2195_v62 = vld [vmem:[#allocation13_spill] sm:$0xff]  ;;  %v1229_v8 = vld [vmem:[#allocation2 + $0xf8] sm:$0xff] }
 0x16a   :  { %v355_v46 = vpop.xlane.xlu0 %354  ;;  %1017 = vst [vmem:[#allocation5 + $0xc0] sm:$0xff] %v953_v32  ;;  %v885_v29 = vmul.f32 %v1226_v47, %v1134_v27  ;;  %1143 = vrsqrt.f32 %v763_v21  ;;  %v701_v52 = vmax.f32 %v637_v61, 0.0  ;;  %v511_v33 = vmul.f32 0.0078125, %v357_v3  ;;  %v1230_v27 = vld [vmem:[#allocation2 + $0xf0] sm:$0xff] }
 0x16b   :  { %v956_v45 = vmul.f32 %v1909_v36, %v886_v19  ;;  %1145 = vrsqrt.f32 %v762_v9  ;;  %v700_v35 = vmax.f32 %v636_v57, 0.0  ;;  %v510_v22 = vmul.f32 0.0078125, %v355_v46 }
 0x16c   :  { %v1136_v1 = vpop.eup %1135  ;;  %v955_v55 = vmul.f32 %v1909_v36, %v885_v29  ;;  %v765_v43 = vadd.f32 1e-05, %v701_v52  ;;  %v639_v30 = vsub.f32 %v511_v33, %v1912_v16  ;;  %v463_v2 = vmul.f32 0.0078125, %v2194_v12  ;;  %v1231_v33 = vld [vmem:[#allocation2 + $0x108] sm:$0xff] }
 0x16d   :  { %v1138_v59 = vpop.eup %1137  ;;  %1020 = vst [vmem:[#allocation5 + $0xd8] sm:$0xff] %v956_v45  ;;  %v888_v49 = vmul.f32 %v1227_v48, %v1136_v1  ;;  %v764_v56 = vadd.f32 1e-05, %v700_v35  ;;  %v638_v38 = vsub.f32 %v510_v22, %v1914_v58  ;;  %v361_v14 = vpop.xlane.xlu1 %360  ;;  %v462_v44 = vmul.f32 0.0078125, %v2195_v62 }
 0x16e   :  { %v359_v31 = vpop.xlane.xlu0 %358  ;;  %1019 = vst [vmem:[#allocation5 + $0xd0] sm:$0xff] %v955_v55  ;;  %v887_v42 = vmul.f32 %v1228_v63, %v1138_v59  ;;  %1147 = vrsqrt.f32 %v765_v43  ;;  %v703_v11 = vmax.f32 %v639_v30, 0.0  ;;  %v513_v50 = vmul.f32 0.0078125, %v361_v14  ;;  %v1232_v43 = vld [vmem:[#allocation2 + $0x100] sm:$0xff]  ;;  %v2196_v14 = vld [vmem:[#allocation14_spill] sm:$0xff] }
 0x16f   :  { %v958_v18 = vmul.f32 %v1909_v36, %v888_v49  ;;  %1149 = vrsqrt.f32 %v764_v56  ;;  %v702_v16 = vmax.f32 %v638_v38, 0.0  ;;  %v512_v20 = vmul.f32 0.0078125, %v359_v31 }
 0x170   :  { %v1140_v6 = vpop.eup %1139  ;;  %v957_v25 = vmul.f32 %v1909_v36, %v887_v42  ;;  %v767_v60 = vadd.f32 1e-05, %v703_v11  ;;  %v641_v58 = vsub.f32 %v513_v50, %v1928_v17  ;;  %v2030_v3 = vmul.f32 %v463_v2, %v463_v2  ;;  %v2197_v50 = vld [vmem:[#allocation15_spill] sm:$0xff] }
 0x171   :  { %v1142_v53 = vpop.eup %1141  ;;  %1022 = vst [vmem:[#allocation5 + $0xe8] sm:$0xff] %v958_v18  ;;  %v890_v23 = vmul.f32 %v1229_v8, %v1140_v6  ;;  %v766_v10 = vadd.f32 1e-05, %v702_v16  ;;  %v640_v32 = vsub.f32 %v512_v20, %v1932_v26  ;;  %v365_v21 = vpop.xlane.xlu1 %364  ;;  %v2034_v52 = vmul.f32 %v462_v44, %v462_v44  ;;  %v1233_v16 = vld [vmem:[#allocation2 + $0x118] sm:$0xff] }
 0x172   :  { %v363_v61 = vpop.xlane.xlu0 %362  ;;  %1021 = vst [vmem:[#allocation5 + $0xe0] sm:$0xff] %v957_v25  ;;  %v889_v28 = vmul.f32 %v1230_v27, %v1142_v53  ;;  %1151 = vrsqrt.f32 %v767_v60  ;;  %v705_v13 = vmax.f32 %v641_v58, 0.0  ;;  %v515_v0 = vmul.f32 0.0078125, %v365_v21  ;;  %v1234_v60 = vld [vmem:[#allocation2 + $0x110] sm:$0xff] }
 0x173   :  { %v960_v19 = vmul.f32 %v1909_v36, %v890_v23  ;;  %1153 = vrsqrt.f32 %v766_v10  ;;  %v704_v17 = vmax.f32 %v640_v32, 0.0  ;;  %v514_v9 = vmul.f32 0.0078125, %v363_v61 }
 0x174   :  { %v1144_v57 = vpop.eup %1143  ;;  %v959_v46 = vmul.f32 %v1909_v36, %v889_v28  ;;  %v769_v47 = vadd.f32 1e-05, %v705_v13  ;;  %v643_v26 = vsub.f32 %v515_v0, %v1946_v39  ;;  %v465_v31 = vmul.f32 0.0078125, %v2196_v14  ;;  %v1235_v28 = vld [vmem:[#allocation2 + $0x128] sm:$0xff] }
 0x175   :  { %v1146_v29 = vpop.eup %1145  ;;  %1024 = vst [vmem:[#allocation5 + $0xf8] sm:$0xff] %v960_v19  ;;  %v892_v45 = vmul.f32 %v1231_v33, %v1144_v57  ;;  %v768_v35 = vadd.f32 1e-05, %v704_v17  ;;  %v642_v22 = vsub.f32 %v514_v9, %v1950_v51  ;;  %v369_v1 = vpop.xlane.xlu1 %368  ;;  %v464_v18 = vmul.f32 0.0078125, %v2197_v50  ;;  %v1236_v57 = vld [vmem:[#allocation2 + $0x120] sm:$0xff] }
 0x176   :  { %v367_v55 = vpop.xlane.xlu0 %366  ;;  %1023 = vst [vmem:[#allocation5 + $0xf0] sm:$0xff] %v959_v46  ;;  %v891_v30 = vmul.f32 %v1232_v43, %v1146_v29  ;;  %1155 = vrsqrt.f32 %v769_v47  ;;  %v707_v59 = vmax.f32 %v643_v26, 0.0  ;;  %v517_v48 = vmul.f32 0.0078125, %v369_v1 }
 0x177   :  { %v962_v49 = vmul.f32 %v1909_v36, %v892_v45  ;;  %1157 = vrsqrt.f32 %v768_v35  ;;  %v706_v39 = vmax.f32 %v642_v22, 0.0  ;;  %v516_v56 = vmul.f32 0.0078125, %v367_v55  ;;  %v2198_v35 = vld [vmem:[#allocation23_spill] sm:$0xff] }
 0x178   :  { %v1148_v38 = vpop.eup %1147  ;;  %v961_v63 = vmul.f32 %v1909_v36, %v891_v30  ;;  %v771_v42 = vadd.f32 1e-05, %v707_v59  ;;  %v645_v51 = vsub.f32 %v517_v48, %v1960_v41  ;;  %v2044_v10 = vmul.f32 %v465_v31, %v465_v31  ;;  %v2199_v30 = vld [vmem:[#allocation24_spill] sm:$0xff]  ;;  %v1237_v48 = vld [vmem:[#allocation2 + $0x138] sm:$0xff]  ;;  %v1238_v31 = vld [vmem:[#allocation2 + $0x130] sm:$0xff] }
 0x179   :  { %v1150_v11 = vpop.eup %1149  ;;  %1026 = vst [vmem:[#allocation5 + $0x108] sm:$0xff] %v962_v49  ;;  %v894_v20 = vmul.f32 %v1233_v16, %v1148_v38  ;;  %v770_v6 = vadd.f32 1e-05, %v706_v39  ;;  %v644_v12 = vsub.f32 %v516_v56, %v1964_v7  ;;  %v373_v2 = vpop.xlane.xlu1 %372  ;;  %v2048_v27 = vmul.f32 %v464_v18, %v464_v18 }
 0x17a   :  { %v371_v25 = vpop.xlane.xlu0 %370  ;;  %1025 = vst [vmem:[#allocation5 + $0x100] sm:$0xff] %v961_v63  ;;  %v893_v58 = vmul.f32 %v1234_v60, %v1150_v11  ;;  %1159 = vrsqrt.f32 %v771_v42  ;;  %v709_v53 = vmax.f32 %v645_v51, 0.0  ;;  %v519_v62 = vmul.f32 0.0078125, %v373_v2 }
 0x17b   :  { %v964_v44 = vmul.f32 %v1909_v36, %v894_v20  ;;  %1161 = vrsqrt.f32 %v770_v6  ;;  %v708_v41 = vmax.f32 %v644_v12, 0.0  ;;  %v518_v8 = vmul.f32 0.0078125, %v371_v25  ;;  %v1239_v25 = vld [vmem:[#allocation2 + $0x148] sm:$0xff] }
 0x17c   :  { %v1152_v23 = vpop.eup %1151  ;;  %v963_v32 = vmul.f32 %v1909_v36, %v893_v58  ;;  %v773_v21 = vadd.f32 1e-05, %v709_v53  ;;  %v647_v7 = vsub.f32 %v519_v62, %v1974_v15  ;;  %v467_v22 = vmul.f32 0.0078125, %v2198_v35 }
 0x17d   :  { %v1154_v61 = vpop.eup %1153  ;;  %1028 = vst [vmem:[#allocation5 + $0x118] sm:$0xff] %v964_v44  ;;  %v896_v13 = vmul.f32 %v1235_v28, %v1152_v23  ;;  %v772_v0 = vadd.f32 1e-05, %v708_v41  ;;  %v646_v19 = vsub.f32 %v518_v8, %v1978_v54  ;;  %v377_v17 = vpop.xlane.xlu1 %376  ;;  %v466_v59 = vmul.f32 0.0078125, %v2199_v30  ;;  %v1240_v41 = vld [vmem:[#allocation2 + $0x140] sm:$0xff]  ;;  %v2200_v28 = vld [vmem:[#allocation25_spill] sm:$0xff] }
 0x17e   :  { %v375_v9 = vpop.xlane.xlu0 %374  ;;  %1027 = vst [vmem:[#allocation5 + $0x110] sm:$0xff] %v963_v32  ;;  %v895_v46 = vmul.f32 %v1236_v57, %v1154_v61  ;;  %1163 = vrsqrt.f32 %v773_v21  ;;  %v711_v47 = vmax.f32 %v647_v7, 0.0  ;;  %v521_v26 = vmul.f32 0.0078125, %v377_v17 }
 0x17f   :  { %v966_v29 = vmul.f32 %v1909_v36, %v896_v13  ;;  %1165 = vrsqrt.f32 %v772_v0  ;;  %v710_v15 = vmax.f32 %v646_v19, 0.0  ;;  %v520_v33 = vmul.f32 0.0078125, %v375_v9  ;;  %v2201_v9 = vld [vmem:[#allocation26_spill] sm:$0xff] }
 0x180   :  { %v1156_v45 = vpop.eup %1155  ;;  %v965_v1 = vmul.f32 %v1909_v36, %v895_v46  ;;  %v775_v55 = vadd.f32 1e-05, %v711_v47  ;;  %v649_v54 = vsub.f32 %v521_v26, %v1988_v24  ;;  %v2058_v16 = vmul.f32 %v467_v22, %v467_v22  ;;  %v1241_v46 = vld [vmem:[#allocation2 + $0x158] sm:$0xff] }
 0x181   :  { %v1158_v43 = vpop.eup %1157  ;;  %1030 = vst [vmem:[#allocation5 + $0x128] sm:$0xff] %v966_v29  ;;  %v898_v49 = vmul.f32 %v1237_v48, %v1156_v45  ;;  %v774_v39 = vadd.f32 1e-05, %v710_v15  ;;  %v648_v56 = vsub.f32 %v520_v33, %v1992_v4  ;;  %v381_v38 = vpop.xlane.xlu1 %380  ;;  %v2062_v2 = vmul.f32 %v466_v59, %v466_v59  ;;  %v1242_v45 = vld [vmem:[#allocation2 + $0x150] sm:$0xff] }
 0x182   :  { %v379_v14 = vpop.xlane.xlu0 %378  ;;  %1029 = vst [vmem:[#allocation5 + $0x120] sm:$0xff] %v965_v1  ;;  %v897_v63 = vmul.f32 %v1238_v31, %v1158_v43  ;;  %1167 = vrsqrt.f32 %v775_v55  ;;  %v713_v42 = vmax.f32 %v649_v54, 0.0  ;;  %v523_v51 = vmul.f32 0.0078125, %v381_v38 }
 0x183   :  { %v968_v11 = vmul.f32 %v1909_v36, %v898_v49  ;;  %1169 = vrsqrt.f32 %v774_v39  ;;  %v712_v24 = vmax.f32 %v648_v56, 0.0  ;;  %v522_v50 = vmul.f32 0.0078125, %v379_v14  ;;  %v1243_v56 = vld [vmem:[#allocation2 + $0x168] sm:$0xff] }
 0x184   :  { %v1160_v18 = vpop.eup %1159  ;;  %v967_v20 = vmul.f32 %v1909_v36, %v897_v63  ;;  %v777_v6 = vadd.f32 1e-05, %v713_v42  ;;  %v651_v4 = vsub.f32 %v523_v51, %v2002_v37  ;;  %v469_v13 = vmul.f32 0.0078125, %v2200_v28  ;;  %v1244_v51 = vld [vmem:[#allocation2 + $0x160] sm:$0xff] }
 0x185   :  { %v1162_v12 = vpop.eup %1161  ;;  %1032 = vst [vmem:[#allocation5 + $0x138] sm:$0xff] %v968_v11  ;;  %v900_v60 = vmul.f32 %v1239_v25, %v1160_v18  ;;  %v776_v58 = vadd.f32 1e-05, %v712_v24  ;;  %v650_v53 = vsub.f32 %v522_v50, %v2006_v40  ;;  %v385_v62 = vpop.xlane.xlu1 %384  ;;  %v468_v57 = vmul.f32 0.0078125, %v2201_v9 }
 0x186   :  { %v383_v44 = vpop.xlane.xlu0 %382  ;;  %1031 = vst [vmem:[#allocation5 + $0x130] sm:$0xff] %v967_v20  ;;  %v899_v8 = vmul.f32 %v1240_v41, %v1162_v12  ;;  %1171 = vrsqrt.f32 %v777_v6  ;;  %v715_v23 = vmax.f32 %v651_v4, 0.0  ;;  %v525_v32 = vmul.f32 0.0078125, %v385_v62  ;;  %v2202_v4 = vld [vmem:[#allocation27_spill] sm:$0xff] }
 0x187   :  { %v970_v21 = vmul.f32 %v1909_v36, %v900_v60  ;;  %1173 = vrsqrt.f32 %v776_v58  ;;  %v714_v37 = vmax.f32 %v650_v53, 0.0  ;;  %v524_v7 = vmul.f32 0.0078125, %v383_v44  ;;  %v2203_v53 = vld [vmem:[#allocation28_spill] sm:$0xff]  ;;  %v1245_v44 = vld [vmem:[#allocation2 + $0x178] sm:$0xff] }
 0x188   :  { %v1164_v61 = vpop.eup %1163  ;;  %v969_v0 = vmul.f32 %v1909_v36, %v899_v8  ;;  %v779_v19 = vadd.f32 1e-05, %v715_v23  ;;  %v653_v40 = vsub.f32 %v525_v32, %v2016_v34  ;;  %v2072_v30 = vmul.f32 %v469_v13, %v469_v13 }
 0x189   :  { %v1166_v17 = vpop.eup %1165  ;;  %1034 = vst [vmem:[#allocation5 + $0x148] sm:$0xff] %v970_v21  ;;  %v902_v47 = vmul.f32 %v1241_v46, %v1164_v61  ;;  %v778_v26 = vadd.f32 1e-05, %v714_v37  ;;  %v652_v29 = vsub.f32 %v524_v7, %v2020_v5  ;;  %v389_v15 = vpop.xlane.xlu1 %388  ;;  %v2076_v39 = vmul.f32 %v468_v57, %v468_v57  ;;  %v1246_v37 = vld [vmem:[#allocation2 + $0x170] sm:$0xff] }
 0x18a   :  { %v387_v33 = vpop.xlane.xlu0 %386  ;;  %1033 = vst [vmem:[#allocation5 + $0x140] sm:$0xff] %v969_v0  ;;  %v901_v35 = vmul.f32 %v1242_v45, %v1166_v17  ;;  %1175 = vrsqrt.f32 %v779_v19  ;;  %v717_v22 = vmax.f32 %v653_v40, 0.0  ;;  %v527_v1 = vmul.f32 0.0078125, %v389_v15 }
 0x18b   :  { %v972_v55 = vmul.f32 %v1909_v36, %v902_v47  ;;  %1177 = vrsqrt.f32 %v778_v26  ;;  %v716_v34 = vmax.f32 %v652_v29, 0.0  ;;  %v526_v54 = vmul.f32 0.0078125, %v387_v33  ;;  %v1248_v47 = vld [vmem:[#allocation2 + $0x188] sm:$0xff] }
 0x18c   :  { %v1168_v43 = vpop.eup %1167  ;;  %v971_v59 = vmul.f32 %v1909_v36, %v901_v35  ;;  %v781_v48 = vadd.f32 1e-05, %v717_v22  ;;  %v655_v5 = vsub.f32 %v527_v1, %v2030_v3  ;;  %v471_v12 = vmul.f32 0.0078125, %v2202_v4  ;;  %v1249_v35 = vld [vmem:[#allocation2 + $0x180] sm:$0xff] }
 0x18d   :  { %v1170_v49 = vpop.eup %1169  ;;  %1036 = vst [vmem:[#allocation5 + $0x158] sm:$0xff] %v972_v55  ;;  %v904_v38 = vmul.f32 %v1243_v56, %v1168_v43  ;;  %v780_v14 = vadd.f32 1e-05, %v716_v34  ;;  %v654_v31 = vsub.f32 %v526_v54, %v2034_v52  ;;  %v393_v63 = vpop.xlane.xlu1 %392  ;;  %v470_v62 = vmul.f32 0.0078125, %v2203_v53 }
 0x18e   :  { %v391_v42 = vpop.xlane.xlu0 %390  ;;  %1035 = vst [vmem:[#allocation5 + $0x150] sm:$0xff] %v971_v59  ;;  %v903_v11 = vmul.f32 %v1244_v51, %v1170_v49  ;;  %1179 = vrsqrt.f32 %v781_v48  ;;  %v719_v24 = vmax.f32 %v655_v5, 0.0  ;;  %v529_v50 = vmul.f32 0.0078125, %v393_v63  ;;  %v2204_v59 = vld [vmem:[#allocation29_spill] sm:$0xff] }
 0x18f   :  { %v974_v18 = vmul.f32 %v1909_v36, %v904_v38  ;;  %1181 = vrsqrt.f32 %v780_v14  ;;  %v718_v3 = vmax.f32 %v654_v31, 0.0  ;;  %v528_v20 = vmul.f32 0.0078125, %v391_v42  ;;  %v2205_v38 = vld [vmem:[#allocation30_spill] sm:$0xff]  ;;  %v1250_v31 = vld [vmem:[#allocation2 + $0x198] sm:$0xff] }
 0x190   :  { %v1172_v6 = vpop.eup %1171  ;;  %v973_v25 = vmul.f32 %v1909_v36, %v903_v11  ;;  %v783_v60 = vadd.f32 1e-05, %v719_v24  ;;  %v657_v52 = vsub.f32 %v529_v50, %v2044_v10  ;;  %v2088_v10 = vld [vmem:[%s2136_s1] ss:$0 sm:$0xff]  ;;  %v2095_v46 = vmul.f32 %v470_v62, %v470_v62  ;;  %v1251_v50 = vld [vmem:[#allocation2 + $0x190] sm:$0xff]  ;;  %v1252_v62 = vld [vmem:[#allocation2 + $0x1a8] sm:$0xff] }
 0x191   :  { %v1174_v58 = vpop.eup %1173  ;;  %1038 = vst [vmem:[#allocation5 + $0x168] sm:$0xff] %v974_v18  ;;  %v906_v41 = vmul.f32 %v1245_v44, %v1172_v6  ;;  %v782_v8 = vadd.f32 1e-05, %v718_v3  ;;  %v656_v23 = vsub.f32 %v528_v20, %v2048_v27  ;;  %v397_v32 = vpop.xlane.xlu1 %396  ;;  %v2091_v27 = vmul.f32 %v471_v12, %v471_v12  ;;  %s1315_s1 = smov [#allocation5]  }
 0x192   :  { %v395_v21 = vpop.xlane.xlu0 %394  ;;  %1037 = vst [vmem:[#allocation5 + $0x160] sm:$0xff] %v973_v25  ;;  %v905_v7 = vmul.f32 %v1246_v37, %v1174_v58  ;;  %1183 = vrsqrt.f32 %v783_v60  ;;  %v721_v61 = vmax.f32 %v657_v52, 0.0  ;;  %v531_v36 = vmul.f32 0.0078125, %v397_v32  ;;  %s1062_s26 = sshll.u32 %s1315_s1, 4  ;;  %s1063_s26 = int_to_ptr.vmem [resolvable:$true] %s1062_s26 }
 0x193   :  { %v976_v28 = vmul.f32 %v2088_v10, %v906_v41  ;;  %1185 = vrsqrt.f32 %v782_v8  ;;  %v720_v13 = vmax.f32 %v656_v23, 0.0  ;;  %v530_v0 = vmul.f32 0.0078125, %v395_v21  ;;  %v1253_v21 = vld [vmem:[#allocation2 + $0x1a0] sm:$0xff]  ;;  %s1286_s27 = scalar_lea.vmem %s1063_s26, 8192  ;;  %p1291_p9 = scmp.lt.s32.totalorder %s1063_s26, %s1063_s26 }
 0x194   :  { %v1176_v19 = vpop.eup %1175  ;;  %v975_v40 = vmul.f32 %v2088_v10, %v905_v7  ;;  %v785_v17 = vadd.f32 1e-05, %v721_v61  ;;  %v659_v9 = vsub.f32 %v531_v36, %v2058_v16  ;;  %v473_v48 = vmul.f32 0.0078125, %v2204_v59  ;;  %p1287_p8 = scmp.ne.s32.totalorder %s1063_s26, %s1286_s27  ;;  %p1292_p10 = scmp.lt.s32.totalorder %s1286_s27, %s1286_s27 }
 0x195   :  { %v1178_v57 = vpop.eup %1177  ;;  %1040 = vst [vmem:[#allocation5 + $0x178] sm:$0xff] %v976_v28  ;;  %v908_v26 = vmul.f32 %v1248_v47, %v1176_v19  ;;  %v784_v29 = vadd.f32 1e-05, %v720_v13  ;;  %v658_v15 = vsub.f32 %v530_v0, %v2062_v2  ;;  %v401_v33 = vpop.xlane.xlu1 %400  ;;  %v472_v14 = vmul.f32 0.0078125, %v2205_v38 }
 0x196   :  { %v399_v45 = vpop.xlane.xlu0 %398  ;;  %1039 = vst [vmem:[#allocation5 + $0x170] sm:$0xff] %v975_v40  ;;  %v907_v22 = vmul.f32 %v1249_v35, %v1178_v57  ;;  %1187 = vrsqrt.f32 %v785_v17  ;;  %v723_v1 = vmax.f32 %v659_v9, 0.0  ;;  %v533_v55 = vmul.f32 0.0078125, %v401_v33  ;;  %v1254_v9 = vld [vmem:[#allocation2 + $0x1b8] sm:$0xff]  ;;  %p1293_p11 = por %p1292_p10, %p1291_p9 }
 0x197   :  { %v978_v34 = vmul.f32 %v2088_v10, %v908_v26  ;;  %1189 = vrsqrt.f32 %v784_v29  ;;  %v722_v16 = vmax.f32 %v658_v15, 0.0  ;;  %v532_v54 = vmul.f32 0.0078125, %v399_v45  ;;  %v1255_v26 = vld [vmem:[#allocation2 + $0x1b0] sm:$0xff] }
 0x198   :  { %v1180_v43 = vpop.eup %1179  ;;  %v977_v5 = vmul.f32 %v2088_v10, %v907_v22  ;;  %v787_v49 = vadd.f32 1e-05, %v723_v1  ;;  %v661_v2 = vsub.f32 %v533_v55, %v2072_v30  ;;  %v601_v25 = vmul.f32 %v473_v48, %v473_v48  ;;  %p1294_p12 = pnand %p1293_p11, %p1287_p8 }
 0x199   :  { %v1182_v56 = vpop.eup %1181  ;;  %1042 = vst [vmem:[#allocation5 + $0x188] sm:$0xff] %v978_v34  ;;  %v910_v63 = vmul.f32 %v1250_v31, %v1180_v43  ;;  %v786_v42 = vadd.f32 1e-05, %v722_v16  ;;  %v660_v51 = vsub.f32 %v532_v54, %v2076_v39  ;;  %v405_v11 = vpop.xlane.xlu1 %404  ;;  %v600_v53 = vmul.f32 %v472_v14, %v472_v14  ;;  %v1256_v34 = vld [vmem:[#allocation2 + $0x1c8] sm:$0xff]  ;;  %v1257_v43 = vld [vmem:[#allocation2 + $0x1c0] sm:$0xff]  ;;  %v1259_v14 = vld [vmem:[#allocation2 + $0x1d0] sm:$0xff] }
 0x19a   :  { %v403_v24 = vpop.xlane.xlu0 %402  ;;  %1041 = vst [vmem:[#allocation5 + $0x180] sm:$0xff] %v977_v5  ;;  %v909_v18 = vmul.f32 %v1251_v50, %v1182_v56  ;;  %1191 = vrsqrt.f32 %v787_v49  ;;  %v725_v3 = vmax.f32 %v661_v2, 0.0  ;;  %v535_v20 = vmul.f32 0.0078125, %v405_v11  ;;  %v1258_v56 = vld [vmem:[#allocation2 + $0x1d8] sm:$0xff] }
 0x19b   :  { %v980_v6 = vmul.f32 %v2088_v10, %v910_v63  ;;  %1193 = vrsqrt.f32 %v786_v42  ;;  %v724_v30 = vmax.f32 %v660_v51, 0.0  ;;  %v534_v4 = vmul.f32 0.0078125, %v403_v24  ;;  %v1260_v24 = vld [vmem:[#allocation2 + $0x1e8] sm:$0xff] }
 0x19c   :  { %v1184_v12 = vpop.eup %1183  ;;  %v979_v60 = vmul.f32 %v2088_v10, %v909_v18  ;;  %v789_v52 = vadd.f32 1e-05, %v725_v3  ;;  %v663_v39 = vsub.f32 %v535_v20, %v2091_v27  ;;  %v1261_v18 = vld [vmem:[#allocation2 + $0x1e0] sm:$0xff] }
 0x19d   :  { %v1186_v58 = vpop.eup %1185  ;;  %1044 = vst [vmem:[#allocation5 + $0x198] sm:$0xff] %v980_v6  ;;  %v912_v44 = vmul.f32 %v1252_v62, %v1184_v12  ;;  %v788_v41 = vadd.f32 1e-05, %v724_v30  ;;  %v662_v8 = vsub.f32 %v534_v4, %v2095_v46  ;;  %v409_v23 = vpop.xlane.xlu1 %408  ;;  %v1262_v12 = vld [vmem:[#allocation2 + $0x1f8] sm:$0xff] }
 0x19e   :  { %v407_v32 = vpop.xlane.xlu0 %406  ;;  %1043 = vst [vmem:[#allocation5 + $0x190] sm:$0xff] %v979_v60  ;;  %v911_v37 = vmul.f32 %v1253_v21, %v1186_v58  ;;  %1195 = vrsqrt.f32 %v789_v52  ;;  %v727_v7 = vmax.f32 %v663_v39, 0.0  ;;  %v537_v61 = vmul.f32 0.0078125, %v409_v23  ;;  %v1263_v60 = vld [vmem:[#allocation2 + $0x1f0] sm:$0xff] }
 0x19f   :  { %v982_v36 = vmul.f32 %v2088_v10, %v912_v44  ;;  %1197 = vrsqrt.f32 %v788_v41  ;;  %v726_v28 = vmax.f32 %v662_v8, 0.0  ;;  %v536_v13 = vmul.f32 0.0078125, %v407_v32 }
 0x1a0   :  { %v1188_v0 = vpop.eup %1187  ;;  %v981_v19 = vmul.f32 %v2088_v10, %v911_v37  ;;  %v791_v27 = vadd.f32 1e-05, %v727_v7  ;;  %v665_v40 = vsub.f32 %v537_v61, %v601_v25 }
 0x1a1   :  { %v1190_v17 = vpop.eup %1189  ;;  %1046 = vst [vmem:[#allocation5 + $0x1a8] sm:$0xff] %v982_v36  ;;  %v914_v57 = vmul.f32 %v1254_v9, %v1188_v0  ;;  %v790_v46 = vadd.f32 1e-05, %v726_v28  ;;  %v664_v47 = vsub.f32 %v536_v13, %v600_v53 }
 0x1a2   :  { %1045 = vst [vmem:[#allocation5 + $0x1a0] sm:$0xff] %v981_v19  ;;  %v913_v29 = vmul.f32 %v1255_v26, %v1190_v17  ;;  %1199 = vrsqrt.f32 %v791_v27  ;;  %v729_v15 = vmax.f32 %v665_v40, 0.0 }
 0x1a3   :  { %v984_v33 = vmul.f32 %v2088_v10, %v914_v57  ;;  %1201 = vrsqrt.f32 %v790_v46  ;;  %v728_v45 = vmax.f32 %v664_v47, 0.0 }
 0x1a4   :  { %v1192_v35 = vpop.eup %1191  ;;  %v983_v22 = vmul.f32 %v2088_v10, %v913_v29  ;;  %v793_v1 = vadd.f32 1e-05, %v729_v15 }
 0x1a5   :  { %v1194_v55 = vpop.eup %1193  ;;  %1048 = vst [vmem:[#allocation5 + $0x1b8] sm:$0xff] %v984_v33  ;;  %v916_v16 = vmul.f32 %v1256_v34, %v1192_v35  ;;  %v792_v54 = vadd.f32 1e-05, %v728_v45 }
 0x1a6   :  { %1047 = vst [vmem:[#allocation5 + $0x1b0] sm:$0xff] %v983_v22  ;;  %v915_v59 = vmul.f32 %v1257_v43, %v1194_v55  ;;  %1203 = vrsqrt.f32 %v793_v1 }
 0x1a7   :  { %v986_v48 = vmul.f32 %v2088_v10, %v916_v16  ;;  %1205 = vrsqrt.f32 %v792_v54 }
 0x1a8   :  { %v1196_v5 = vpop.eup %1195  ;;  %v985_v49 = vmul.f32 %v2088_v10, %v915_v59 }
 0x1a9   :  { %v1198_v2 = vpop.eup %1197  ;;  %1050 = vst [vmem:[#allocation5 + $0x1c8] sm:$0xff] %v986_v48  ;;  %v918_v38 = vmul.f32 %v1258_v56, %v1196_v5 }
 0x1aa   :  { %1049 = vst [vmem:[#allocation5 + $0x1c0] sm:$0xff] %v985_v49  ;;  %v917_v31 = vmul.f32 %v1259_v14, %v1198_v2 }
 0x1ab   :  { %v988_v63 = vmul.f32 %v2088_v10, %v918_v38 }
 0x1ac   :  { %v1200_v42 = vpop.eup %1199  ;;  %v987_v51 = vmul.f32 %v2088_v10, %v917_v31 }
 0x1ad   :  { %v1202_v11 = vpop.eup %1201  ;;  %1052 = vst [vmem:[#allocation5 + $0x1d8] sm:$0xff] %v988_v63  ;;  %v920_v50 = vmul.f32 %v1260_v24, %v1200_v42 }
 0x1ae   :  { %1051 = vst [vmem:[#allocation5 + $0x1d0] sm:$0xff] %v987_v51  ;;  %v919_v3 = vmul.f32 %v1261_v18, %v1202_v11 }
 0x1af   :  { %v990_v20 = vmul.f32 %v2088_v10, %v920_v50 }
 0x1b0   :  { %v1204_v6 = vpop.eup %1203  ;;  %v989_v30 = vmul.f32 %v2088_v10, %v919_v3 }
 0x1b1   :  { %v1206_v4 = vpop.eup %1205  ;;  %1054 = vst [vmem:[#allocation5 + $0x1e8] sm:$0xff] %v990_v20  ;;  %v922_v25 = vmul.f32 %v1262_v12, %v1204_v6 }
 0x1b2   :  { %1053 = vst [vmem:[#allocation5 + $0x1e0] sm:$0xff] %v989_v30  ;;  %v921_v52 = vmul.f32 %v1263_v60, %v1206_v4 }
 0x1b3   :  { %v992_v39 = vmul.f32 %v2088_v10, %v922_v25 }
 0x1b4   :  { %v991_v58 = vmul.f32 %v2088_v10, %v921_v52 }
 0x1b5   :  { %1056 = vst [vmem:[#allocation5 + $0x1f8] sm:$0xff] %v992_v39 }
 0x1b6   :  { %1055 = vst [vmem:[#allocation5 + $0x1f0] sm:$0xff] %v991_v58 }
 0x1b7   :  { %1297 = shalt.err (!%p1294_p12)
}
 0x1b8   :  { %s1298_s30 = scalar_lea.hbm %s2137_s2, 8192 }
 0x1b9   :  { %p1299_p13 = scmp.ne.s32.totalorder %s2137_s2, %s1298_s30  ;;  %p1302_p0 = scmp.lt.u32.totalorder %s1298_s30, %s2137_s2 }
 0x1bb   :  { %p1304_p1 = pnand %p1302_p0, %p1299_p13 }
 0x1bd   :  { %1307 = shalt.err (!%p1304_p1)
}
 0x1be   :  { %1068 = dma.vmem_to_hbm [thread:$0]  %s1063_s26, 8192, %s2137_s2, [#allocation4], %s1313_s19, %s1313_s19, %s1314_s20  }
 0x1bf   :  { %1310 = dma.done.wait [#allocation4], 8192  }
 0x1c0   :  { %1311 = vsyncadd [#allocation4], 4294959104 }
 0x1c1   :  { %1072 = vsyncpa [#allocation3], 1 }
 0x1c2   :  { %1073 = vsyncpa [#allocation4], 1 }

</bundles_post_ra>
